<compile_context>
chip_gen: v6e
topology: v6e:2x2x1
jax: 0.10.0
libtpu: 0.0.40
codegen_flags: <defaults>
</compile_context>

<pallas_src>
import functools
import math

import jax
import jax.numpy as jnp
from jax.experimental import pallas as pl
from jax.experimental.pallas import tpu as pltpu


# --------------------------- parameter synthesis ---------------------------


def init_params(key, *, C, P, S, width, layers, vit_out, ctx_dim):
    """Kernel-ready (stacked, padded, bf16-cast, pre-folded) synthetic params."""
    D = width
    CPP = C * P * P
    CPPp = ((CPP + 127) // 128) * 128           # lane-align the patch vector
    Sp = ((S + 7) // 8) * 8                     # sublane-align the sequence
    keys = iter(jax.random.split(key, 16 + 8 * layers))

    def nrm(shape, scale=0.02):
        return jax.random.normal(next(keys), shape, jnp.float32) * scale

    w_patch = nrm((CPP, D))                      # conv1 (no bias) as a matmul
    cls = nrm((D,))                              # class embedding
    pos = nrm((S, D))                            # positional embedding
    # cls token is only ever added at row 0 of each sequence -> fold it into
    # the positional-embedding row 0 so the prologue is "matmul + add".
    add = pos.at[0, :].add(cls)

    # Zero-pad to TPU-friendly shapes: padded rows/lanes are all-zero so the
    # real rows of every product are bit-identical to the unpadded math.
    w_patch_p = jnp.zeros((CPPp, D), jnp.float32).at[:CPP, :].set(w_patch)
    add_p = jnp.zeros((Sp, D), jnp.float32).at[:S, :].set(add)

    vis_proj = nrm((D, vit_out))                 # visual.proj (no bias)
    w_out = nrm((vit_out, ctx_dim))              # nn.Linear(vit_out, ctx_dim)
    b_out = nrm((ctx_dim,))
    # No nonlinearity between visual.proj and the output Linear -> fold them.
    w_head = vis_proj @ w_out                    # (D, ctx_dim)

    def stack(make):
        return jnp.stack([make() for _ in range(layers)], axis=0)

    return dict(
        w_patch=w_patch_p.astype(jnp.bfloat16),                   # (CPPp, D)
        add=add_p,                                                # (Sp, D) f32
        ln_pre_g=jnp.ones((1, D), jnp.float32),
        ln_pre_b=jnp.zeros((1, D), jnp.float32),
        ln1_g=jnp.ones((layers, 1, D), jnp.float32),
        ln1_b=jnp.zeros((layers, 1, D), jnp.float32),
        w_qkv=stack(lambda: nrm((D, 3 * D))).astype(jnp.bfloat16),
        b_qkv=jnp.zeros((layers, 1, 3 * D), jnp.float32),
        w_o=stack(lambda: nrm((D, D))).astype(jnp.bfloat16),
        b_o=jnp.zeros((layers, 1, D), jnp.float32),
        ln2_g=jnp.ones((layers, 1, D), jnp.float32),
        ln2_b=jnp.zeros((layers, 1, D), jnp.float32),
        w_fc=stack(lambda: nrm((D, 4 * D))).astype(jnp.bfloat16),
        b_fc=jnp.zeros((layers, 1, 4 * D), jnp.float32),
        w_proj=stack(lambda: nrm((4 * D, D))).astype(jnp.bfloat16),
        b_proj=jnp.zeros((layers, 1, D), jnp.float32),
        ln_post_g=jnp.ones((1, D), jnp.float32),
        ln_post_b=jnp.zeros((1, D), jnp.float32),
        w_head=w_head.astype(jnp.bfloat16),                       # (D, ctx)
        b_out=b_out.reshape(1, ctx_dim),                          # (1, ctx) f32
    )


# ------------------------------ forward pass -------------------------------


def clip_image_encoder_forward(params, x, *, patch, width, heads, ctx_dim):
    b, n, C, H, W = x.shape
    B = b * n
    P = patch
    gh, gw = H // P, W // P
    n_patches = gh * gw
    D = width
    assert D % heads == 0
    Dh = D // heads
    S = 1 + n_patches
    CPP = C * P * P
    Sp = params["add"].shape[0]                  # padded sequence length
    CPPp = params["w_patch"].shape[0]            # padded patch-vector length
    assert Sp >= S and CPPp >= CPP
    L = params["w_qkv"].shape[0]
    scale = 1.0 / math.sqrt(Dh)

    # rearrange 'b n c h w -> (b n) c h w' + patchify (conv stride = patch).
    # Row 0 of each sequence is a zero "patch" for the cls token (its embedding
    # comes entirely from the folded pos+cls add matrix); rows >= S and lanes
    # >= CPP are zero padding for vreg alignment.
    xb = x.reshape(B, C, H, W)
    patches = (xb.reshape(B, C, gh, P, gw, P)
                 .transpose(0, 2, 4, 1, 3, 5)
                 .reshape(B, n_patches, CPP))
    paug = jnp.zeros((B, Sp, CPPp), jnp.bfloat16)
    paug = paug.at[:, 1:S, :CPP].set(patches.astype(jnp.bfloat16))

    def kernel(paug_ref, wp_ref, add_ref, g0_ref, b0_ref,
               ln1g_ref, ln1b_ref, wqkv_ref, bqkv_ref, wo_ref, bo_ref,
               ln2g_ref, ln2b_ref, wfc_ref, bfc_ref, wpj_ref, bpj_ref,
               gpost_ref, bpost_ref, whead_ref, bout_ref,
               o_ref, h_ref):
        l = pl.program_id(0)
        bi = pl.program_id(1)

        def ln(xv, g, bb):                       # LayerNorm in f32, eps=1e-5
            mu = jnp.mean(xv, axis=-1, keepdims=True)
            var = jnp.mean(jnp.square(xv - mu), axis=-1, keepdims=True)
            return (xv - mu) * jax.lax.rsqrt(var + 1e-5) * g + bb

        def mm(a, w):                            # bf16 MXU matmul, f32 acc
            return jnp.dot(a.astype(jnp.bfloat16), w,
                           preferred_element_type=jnp.float32)

        # ---- prologue (layer 0): patch embed + (cls + pos) + ln_pre ----
        @pl.when(l == 0)
        def _():
            tok = mm(paug_ref[0], wp_ref[...]) + add_ref[...]     # (Sp, D)
            h_ref[bi] = ln(tok, g0_ref[...], b0_ref[...])

        h = h_ref[bi]                            # (Sp, D) f32, VMEM-resident

        # ---- multi-head self-attention sub-block ----
        x1 = ln(h, ln1g_ref[0], ln1b_ref[0])
        qkv = mm(x1, wqkv_ref[0]) + bqkv_ref[0]                   # (Sp, 3D)
        q = qkv[:, 0:D] * scale                  # scale q once (S*D elems)
        k = qkv[:, D:2 * D]
        v = qkv[:, 2 * D:3 * D]
        # mask padded key positions (rows >= S are not real tokens)
        kmask = jax.lax.broadcasted_iota(jnp.int32, (1, Sp), 1) < S
        neg = jnp.where(kmask, 0.0, -1e30)       # (1, Sp) f32 additive bias
        heads_out = []
        for hd in range(heads):
            cs = slice(hd * Dh, (hd + 1) * Dh)
            qh = q[:, cs].astype(jnp.bfloat16)
            kh = k[:, cs].astype(jnp.bfloat16)
            vh = v[:, cs].astype(jnp.bfloat16)
            s = jax.lax.dot_general(qh, kh, (((1,), (1,)), ((), ())),
                                    preferred_element_type=jnp.float32)
            s = s + neg
            s = s - jnp.max(s, axis=-1, keepdims=True)
            p = jnp.exp(s)
            p = p * pl.reciprocal(jnp.sum(p, axis=-1, keepdims=True),
                                  approx=True)
            heads_out.append(jnp.dot(p.astype(jnp.bfloat16), vh,
                                     preferred_element_type=jnp.float32))
        attn = jnp.concatenate(heads_out, axis=-1)                # (Sp, D) lane-dense
        h = h + mm(attn, wo_ref[0]) + bo_ref[0]

        # ---- MLP sub-block (QuickGELU) ----
        x2 = ln(h, ln2g_ref[0], ln2b_ref[0])
        m = mm(x2, wfc_ref[0]) + bfc_ref[0]
        m = m * jax.nn.sigmoid(1.702 * m)        # QuickGELU in f32
        h = h + mm(m, wpj_ref[0]) + bpj_ref[0]
        h_ref[bi] = h

        # ---- epilogue (last layer): ln_post(cls) @ (vis_proj @ out_proj) ----
        @pl.when(l == pl.num_programs(0) - 1)
        def _():
            cls_tok = ln(h[0:1, :], gpost_ref[...], bpost_ref[...])
            o_ref[0] = mm(cls_tok, whead_ref[...]) + bout_ref[...]

    def full(shape):                             # shared, resident across grid
        return pl.BlockSpec(shape, lambda li, bi: (0,) * len(shape))

    def per_layer(shape):                        # stacked over layers; constant
        return pl.BlockSpec((1,) + shape, lambda li, bi: (li, 0, 0))  # over bi

    # pixel tokens are only consumed at layer 0 -> collapse the block index to
    # 0 for l > 0 so they are not re-streamed once per layer.
    paug_spec = pl.BlockSpec(
        (1, Sp, CPPp), lambda li, bi: (jnp.where(li == 0, bi, 0), 0, 0))

    in_specs = [
        paug_spec,                                                # paug
        full((CPPp, D)),                                          # w_patch
        full((Sp, D)),                                            # pos + cls
        full((1, D)), full((1, D)),                               # ln_pre
        per_layer((1, D)), per_layer((1, D)),                     # ln1
        per_layer((D, 3 * D)), per_layer((1, 3 * D)),             # qkv
        per_layer((D, D)), per_layer((1, D)),                     # attn out proj
        per_layer((1, D)), per_layer((1, D)),                     # ln2
        per_layer((D, 4 * D)), per_layer((1, 4 * D)),             # mlp fc
        per_layer((4 * D, D)), per_layer((1, D)),                 # mlp proj
        full((1, D)), full((1, D)),                               # ln_post
        full((D, ctx_dim)), full((1, ctx_dim)),                   # fused head
    ]
    out_spec = pl.BlockSpec((1, 1, ctx_dim), lambda li, bi: (bi, 0, 0))

    out = pl.pallas_call(
        kernel,
        out_shape=jax.ShapeDtypeStruct((B, 1, ctx_dim), jnp.float32),
        grid_spec=pltpu.PrefetchScalarGridSpec(
            num_scalar_prefetch=0,
            grid=(L, B),                          # layers sequential (outer),
            in_specs=in_specs,                    # batch parallel (inner)
            out_specs=out_spec,
            # all B residual streams stay resident in VMEM across layers
            scratch_shapes=[pltpu.VMEM((B, Sp, D), jnp.float32)],
        ),
        compiler_params=pltpu.CompilerParams(
            dimension_semantics=("arbitrary", "parallel")),
    )(paug,
      params["w_patch"], params["add"], params["ln_pre_g"], params["ln_pre_b"],
      params["ln1_g"], params["ln1_b"], params["w_qkv"], params["b_qkv"],
      params["w_o"], params["b_o"], params["ln2_g"], params["ln2_b"],
      params["w_fc"], params["b_fc"], params["w_proj"], params["b_proj"],
      params["ln_post_g"], params["ln_post_b"], params["w_head"],
      params["b_out"])

    # rearrange '(b n) w -> b n w'
    return out.reshape(b, n, ctx_dim)


# ---------------------------------- main -----------------------------------

if __name__ == "__main__":
    b, n, C, H, W = 2, 2, 3, 16, 16
    patch, width, heads, layers = 8, 128, 4, 2
    vit_out, ctx_dim = 768, 64
    S = 1 + (H // patch) * (W // patch)

    key = jax.random.PRNGKey(0)
    pkey, xkey = jax.random.split(key)
    params = init_params(pkey, C=C, P=patch, S=S, width=width, layers=layers,
                         vit_out=vit_out, ctx_dim=ctx_dim)
    x = jax.random.normal(xkey, (b, n, C, H, W), jnp.float32)

    fwd = jax.jit(functools.partial(clip_image_encoder_forward,
                                    patch=patch, width=width, heads=heads,
                                    ctx_dim=ctx_dim))
    out = jax.block_until_ready(fwd(params, x))
    assert out.shape == (b, n, ctx_dim), out.shape
    assert out.dtype == jnp.float32
    assert bool(jnp.all(jnp.isfinite(out)))
    print("KERNEL_OK")
</pallas_src>

<mosaic_0001>
module attributes {stable_mosaic.version = 11 : i64} {
  func.func @kernel(%arg0: i32, %arg1: i32, %arg2: memref<1x8x256xbf16, #tpu.memory_space<vmem>>, %arg3: memref<256x128xbf16, #tpu.memory_space<vmem>>, %arg4: memref<8x128xf32, #tpu.memory_space<vmem>>, %arg5: memref<1x128xf32, #tpu.memory_space<vmem>>, %arg6: memref<1x128xf32, #tpu.memory_space<vmem>>, %arg7: memref<1x1x128xf32, #tpu.memory_space<vmem>>, %arg8: memref<1x1x128xf32, #tpu.memory_space<vmem>>, %arg9: memref<1x128x384xbf16, #tpu.memory_space<vmem>>, %arg10: memref<1x1x384xf32, #tpu.memory_space<vmem>>, %arg11: memref<1x128x128xbf16, #tpu.memory_space<vmem>>, %arg12: memref<1x1x128xf32, #tpu.memory_space<vmem>>, %arg13: memref<1x1x128xf32, #tpu.memory_space<vmem>>, %arg14: memref<1x1x128xf32, #tpu.memory_space<vmem>>, %arg15: memref<1x128x512xbf16, #tpu.memory_space<vmem>>, %arg16: memref<1x1x512xf32, #tpu.memory_space<vmem>>, %arg17: memref<1x512x128xbf16, #tpu.memory_space<vmem>>, %arg18: memref<1x1x128xf32, #tpu.memory_space<vmem>>, %arg19: memref<1x128xf32, #tpu.memory_space<vmem>>, %arg20: memref<1x128xf32, #tpu.memory_space<vmem>>, %arg21: memref<128x64xbf16, #tpu.memory_space<vmem>>, %arg22: memref<1x64xf32, #tpu.memory_space<vmem>>, %arg23: memref<1x1x64xf32, #tpu.memory_space<vmem>>, %arg24: memref<4x8x128xf32, #tpu.memory_space<vmem>>) attributes {dimension_semantics = [#tpu.dimension_semantics<arbitrary>, #tpu.dimension_semantics<parallel>], iteration_bounds = array<i64: 2, 4>, scalar_prefetch = 0 : i64, scratch_operands = 1 : i64, tpu.core_type = #tpu.core_type<tc>, window_params = [{transform_indices = @transform_0, window_bounds = array<i64: 1, 8, 256>}, {pipeline_mode = #tpu.pipeline_mode<synchronous>, transform_indices = @transform_1, window_bounds = array<i64: 256, 128>}, {pipeline_mode = #tpu.pipeline_mode<synchronous>, transform_indices = @transform_2, window_bounds = array<i64: 8, 128>}, {pipeline_mode = #tpu.pipeline_mode<synchronous>, transform_indices = @transform_3, window_bounds = array<i64: 1, 128>}, {pipeline_mode = #tpu.pipeline_mode<synchronous>, transform_indices = @transform_4, window_bounds = array<i64: 1, 128>}, {transform_indices = @transform_5, window_bounds = array<i64: 1, 1, 128>}, {transform_indices = @transform_6, window_bounds = array<i64: 1, 1, 128>}, {transform_indices = @transform_7, window_bounds = array<i64: 1, 128, 384>}, {transform_indices = @transform_8, window_bounds = array<i64: 1, 1, 384>}, {transform_indices = @transform_9, window_bounds = array<i64: 1, 128, 128>}, {transform_indices = @transform_10, window_bounds = array<i64: 1, 1, 128>}, {transform_indices = @transform_11, window_bounds = array<i64: 1, 1, 128>}, {transform_indices = @transform_12, window_bounds = array<i64: 1, 1, 128>}, {transform_indices = @transform_13, window_bounds = array<i64: 1, 128, 512>}, {transform_indices = @transform_14, window_bounds = array<i64: 1, 1, 512>}, {transform_indices = @transform_15, window_bounds = array<i64: 1, 512, 128>}, {transform_indices = @transform_16, window_bounds = array<i64: 1, 1, 128>}, {pipeline_mode = #tpu.pipeline_mode<synchronous>, transform_indices = @transform_17, window_bounds = array<i64: 1, 128>}, {pipeline_mode = #tpu.pipeline_mode<synchronous>, transform_indices = @transform_18, window_bounds = array<i64: 1, 128>}, {pipeline_mode = #tpu.pipeline_mode<synchronous>, transform_indices = @transform_19, window_bounds = array<i64: 128, 64>}, {pipeline_mode = #tpu.pipeline_mode<synchronous>, transform_indices = @transform_20, window_bounds = array<i64: 1, 64>}, {transform_indices = @transform_21, window_bounds = array<i64: 1, 1, 64>}]} {
    %c0_i32 = arith.constant 0 : i32
    %0 = arith.cmpi eq, %arg0, %c0_i32 : i32
    %1 = arith.extui %0 : i1 to i32
    %c0_i32_0 = arith.constant 0 : i32
    %2 = arith.cmpi ne, %1, %c0_i32_0 : i32
    scf.if %2 {
      %c0_75 = arith.constant 0 : index
      %c0_76 = arith.constant 0 : index
      %c0_77 = arith.constant 0 : index
      %203 = vector.load %arg2[%c0_75, %c0_76, %c0_77] : memref<1x8x256xbf16, #tpu.memory_space<vmem>>, vector<1x8x256xbf16>
      %204 = vector.shape_cast %203 : vector<1x8x256xbf16> to vector<8x256xbf16>
      %c0_78 = arith.constant 0 : index
      %c0_79 = arith.constant 0 : index
      %205 = vector.load %arg3[%c0_78, %c0_79] : memref<256x128xbf16, #tpu.memory_space<vmem>>, vector<256x128xbf16>
      %cst_80 = arith.constant dense<0.000000e+00> : vector<8x128xf32>
      %206 = tpu.matmul %204, %205, %cst_80 {dimension_numbers = #tpu.dot_dimension_numbers<[1], [0], [0], [1], [0, 0, 1, 1], [], []>} : vector<8x256xbf16>, vector<256x128xbf16>, vector<8x128xf32> -> vector<8x128xf32>
      %c0_81 = arith.constant 0 : index
      %c0_82 = arith.constant 0 : index
      %207 = vector.load %arg4[%c0_81, %c0_82] : memref<8x128xf32, #tpu.memory_space<vmem>>, vector<8x128xf32>
      %208 = arith.addf %206, %207 : vector<8x128xf32>
      %c0_83 = arith.constant 0 : index
      %c0_84 = arith.constant 0 : index
      %209 = vector.load %arg5[%c0_83, %c0_84] : memref<1x128xf32, #tpu.memory_space<vmem>>, vector<1x128xf32>
      %c0_85 = arith.constant 0 : index
      %c0_86 = arith.constant 0 : index
      %210 = vector.load %arg6[%c0_85, %c0_86] : memref<1x128xf32, #tpu.memory_space<vmem>>, vector<1x128xf32>
      %cst_87 = arith.constant dense<0.000000e+00> : vector<8xf32>
      %211 = vector.multi_reduction <add>, %208, %cst_87 [1] : vector<8x128xf32> to vector<8xf32>
      %212 = vector.shape_cast %211 : vector<8xf32> to vector<8x1xf32>
      %cst_88 = arith.constant 1.280000e+02 : f32
      %213 = vector.broadcast %cst_88 : f32 to vector<8x1xf32>
      %214 = arith.divf %212, %213 : vector<8x1xf32>
      %215 = vector.broadcast %214 : vector<8x1xf32> to vector<8x128xf32>
      %216 = arith.subf %208, %215 : vector<8x128xf32>
      %217 = arith.mulf %216, %216 : vector<8x128xf32>
      %cst_89 = arith.constant dense<0.000000e+00> : vector<8xf32>
      %218 = vector.multi_reduction <add>, %217, %cst_89 [1] : vector<8x128xf32> to vector<8xf32>
      %219 = vector.shape_cast %218 : vector<8xf32> to vector<8x1xf32>
      %cst_90 = arith.constant 1.280000e+02 : f32
      %220 = vector.broadcast %cst_90 : f32 to vector<8x1xf32>
      %221 = arith.divf %219, %220 : vector<8x1xf32>
      %222 = vector.broadcast %214 : vector<8x1xf32> to vector<8x128xf32>
      %223 = arith.subf %208, %222 : vector<8x128xf32>
      %cst_91 = arith.constant 9.99999974E-6 : f32
      %224 = vector.broadcast %cst_91 : f32 to vector<8x1xf32>
      %225 = arith.addf %221, %224 : vector<8x1xf32>
      %226 = math.rsqrt %225 : vector<8x1xf32>
      %227 = vector.broadcast %226 : vector<8x1xf32> to vector<8x128xf32>
      %228 = arith.mulf %223, %227 : vector<8x128xf32>
      %229 = vector.broadcast %209 : vector<1x128xf32> to vector<8x128xf32>
      %230 = arith.mulf %228, %229 : vector<8x128xf32>
      %231 = vector.broadcast %210 : vector<1x128xf32> to vector<8x128xf32>
      %232 = arith.addf %230, %231 : vector<8x128xf32>
      %233 = arith.index_cast %arg1 : i32 to index
      %c0_92 = arith.constant 0 : index
      %c0_93 = arith.constant 0 : index
      %234 = vector.load %arg24[%233, %c0_92, %c0_93] : memref<4x8x128xf32, #tpu.memory_space<vmem>>, vector<1x8x128xf32>
      %235 = vector.shape_cast %234 : vector<1x8x128xf32> to vector<8x128xf32>
      %236 = vector.shape_cast %232 : vector<8x128xf32> to vector<1x8x128xf32>
      tpu.vector_store %arg24[%233, %c0_92, %c0_93], %236 {strides = array<i32>} : memref<4x8x128xf32, #tpu.memory_space<vmem>>, vector<1x8x128xf32>,
    } else {
    }
    %3 = arith.index_cast %arg1 : i32 to index
    %c0 = arith.constant 0 : index
    %c0_1 = arith.constant 0 : index
    %4 = vector.load %arg24[%3, %c0, %c0_1] : memref<4x8x128xf32, #tpu.memory_space<vmem>>, vector<1x8x128xf32>
    %5 = vector.shape_cast %4 : vector<1x8x128xf32> to vector<8x128xf32>
    %c0_2 = arith.constant 0 : index
    %c0_3 = arith.constant 0 : index
    %c0_4 = arith.constant 0 : index
    %6 = vector.load %arg7[%c0_2, %c0_3, %c0_4] : memref<1x1x128xf32, #tpu.memory_space<vmem>>, vector<1x1x128xf32>
    %7 = vector.shape_cast %6 : vector<1x1x128xf32> to vector<1x128xf32>
    %c0_5 = arith.constant 0 : index
    %c0_6 = arith.constant 0 : index
    %c0_7 = arith.constant 0 : index
    %8 = vector.load %arg8[%c0_5, %c0_6, %c0_7] : memref<1x1x128xf32, #tpu.memory_space<vmem>>, vector<1x1x128xf32>
    %9 = vector.shape_cast %8 : vector<1x1x128xf32> to vector<1x128xf32>
    %cst = arith.constant dense<0.000000e+00> : vector<8xf32>
    %10 = vector.multi_reduction <add>, %5, %cst [1] : vector<8x128xf32> to vector<8xf32>
    %11 = vector.shape_cast %10 : vector<8xf32> to vector<8x1xf32>
    %cst_8 = arith.constant 1.280000e+02 : f32
    %12 = vector.broadcast %cst_8 : f32 to vector<8x1xf32>
    %13 = arith.divf %11, %12 : vector<8x1xf32>
    %14 = vector.broadcast %13 : vector<8x1xf32> to vector<8x128xf32>
    %15 = arith.subf %5, %14 : vector<8x128xf32>
    %16 = arith.mulf %15, %15 : vector<8x128xf32>
    %cst_9 = arith.constant dense<0.000000e+00> : vector<8xf32>
    %17 = vector.multi_reduction <add>, %16, %cst_9 [1] : vector<8x128xf32> to vector<8xf32>
    %18 = vector.shape_cast %17 : vector<8xf32> to vector<8x1xf32>
    %cst_10 = arith.constant 1.280000e+02 : f32
    %19 = vector.broadcast %cst_10 : f32 to vector<8x1xf32>
    %20 = arith.divf %18, %19 : vector<8x1xf32>
    %21 = vector.broadcast %13 : vector<8x1xf32> to vector<8x128xf32>
    %22 = arith.subf %5, %21 : vector<8x128xf32>
    %cst_11 = arith.constant 9.99999974E-6 : f32
    %23 = vector.broadcast %cst_11 : f32 to vector<8x1xf32>
    %24 = arith.addf %20, %23 : vector<8x1xf32>
    %25 = math.rsqrt %24 : vector<8x1xf32>
    %26 = vector.broadcast %25 : vector<8x1xf32> to vector<8x128xf32>
    %27 = arith.mulf %22, %26 : vector<8x128xf32>
    %28 = vector.broadcast %7 : vector<1x128xf32> to vector<8x128xf32>
    %29 = arith.mulf %27, %28 : vector<8x128xf32>
    %30 = vector.broadcast %9 : vector<1x128xf32> to vector<8x128xf32>
    %31 = arith.addf %29, %30 : vector<8x128xf32>
    %c0_12 = arith.constant 0 : index
    %c0_13 = arith.constant 0 : index
    %c0_14 = arith.constant 0 : index
    %32 = vector.load %arg9[%c0_12, %c0_13, %c0_14] : memref<1x128x384xbf16, #tpu.memory_space<vmem>>, vector<1x128x384xbf16>
    %33 = vector.shape_cast %32 : vector<1x128x384xbf16> to vector<128x384xbf16>
    %34 = arith.truncf %31 : vector<8x128xf32> to vector<8x128xbf16>
    %cst_15 = arith.constant dense<0.000000e+00> : vector<8x384xf32>
    %35 = tpu.matmul %34, %33, %cst_15 {dimension_numbers = #tpu.dot_dimension_numbers<[1], [0], [0], [1], [0, 0, 1, 1], [], []>} : vector<8x128xbf16>, vector<128x384xbf16>, vector<8x384xf32> -> vector<8x384xf32>
    %c0_16 = arith.constant 0 : index
    %c0_17 = arith.constant 0 : index
    %c0_18 = arith.constant 0 : index
    %36 = vector.load %arg10[%c0_16, %c0_17, %c0_18] : memref<1x1x384xf32, #tpu.memory_space<vmem>>, vector<1x1x384xf32>
    %37 = vector.shape_cast %36 : vector<1x1x384xf32> to vector<1x384xf32>
    %38 = vector.broadcast %37 : vector<1x384xf32> to vector<8x384xf32>
    %39 = arith.addf %35, %38 : vector<8x384xf32>
    %40 = vector.extract_strided_slice %39 {offsets = [0, 0], sizes = [8, 128], strides = [1, 1]} : vector<8x384xf32> to vector<8x128xf32>
    %cst_19 = arith.constant 0.176776692 : f32
    %41 = vector.broadcast %cst_19 : f32 to vector<8x128xf32>
    %42 = arith.mulf %40, %41 : vector<8x128xf32>
    %43 = vector.extract_strided_slice %39 {offsets = [0, 128], sizes = [8, 128], strides = [1, 1]} : vector<8x384xf32> to vector<8x128xf32>
    %44 = vector.extract_strided_slice %39 {offsets = [0, 256], sizes = [8, 128], strides = [1, 1]} : vector<8x384xf32> to vector<8x128xf32>
    %45 = tpu.iota {dimensions = array<i32: 1>} : vector<1x8xi32>
    %c5_i32 = arith.constant 5 : i32
    %46 = vector.broadcast %c5_i32 : i32 to vector<1x8xi32>
    %47 = arith.cmpi slt, %45, %46 : vector<1x8xi32>
    %cst_20 = arith.constant 0.000000e+00 : f32
    %cst_21 = arith.constant -1.000000e+30 : f32
    %48 = vector.broadcast %cst_20 : f32 to vector<1x8xf32>
    %49 = vector.broadcast %cst_21 : f32 to vector<1x8xf32>
    %50 = arith.select %47, %48, %49 : vector<1x8xi1>, vector<1x8xf32>
    %51 = vector.extract_strided_slice %42 {offsets = [0, 0], sizes = [8, 32], strides = [1, 1]} : vector<8x128xf32> to vector<8x32xf32>
    %52 = arith.truncf %51 : vector<8x32xf32> to vector<8x32xbf16>
    %53 = vector.extract_strided_slice %43 {offsets = [0, 0], sizes = [8, 32], strides = [1, 1]} : vector<8x128xf32> to vector<8x32xf32>
    %54 = arith.truncf %53 : vector<8x32xf32> to vector<8x32xbf16>
    %55 = vector.extract_strided_slice %44 {offsets = [0, 0], sizes = [8, 32], strides = [1, 1]} : vector<8x128xf32> to vector<8x32xf32>
    %56 = arith.truncf %55 : vector<8x32xf32> to vector<8x32xbf16>
    %cst_22 = arith.constant dense<0.000000e+00> : vector<8x8xf32>
    %57 = tpu.matmul %52, %54, %cst_22 {dimension_numbers = #tpu.dot_dimension_numbers<[1], [1], [0], [0], [0, 0, 1, 0], [], []>} : vector<8x32xbf16>, vector<8x32xbf16>, vector<8x8xf32> -> vector<8x8xf32>
    %58 = vector.broadcast %50 : vector<1x8xf32> to vector<8x8xf32>
    %59 = arith.addf %57, %58 : vector<8x8xf32>
    %cst_23 = arith.constant dense<0xFF800000> : vector<8xf32>
    %60 = vector.multi_reduction <maximumf>, %59, %cst_23 [1] : vector<8x8xf32> to vector<8xf32>
    %61 = vector.shape_cast %60 : vector<8xf32> to vector<8x1xf32>
    %62 = vector.broadcast %61 : vector<8x1xf32> to vector<8x8xf32>
    %63 = arith.subf %59, %62 : vector<8x8xf32>
    %64 = math.exp %63 : vector<8x8xf32>
    %cst_24 = arith.constant dense<0.000000e+00> : vector<8xf32>
    %65 = vector.multi_reduction <add>, %64, %cst_24 [1] : vector<8x8xf32> to vector<8xf32>
    %66 = vector.shape_cast %65 : vector<8xf32> to vector<8x1xf32>
    %67 = tpu.reciprocal %66 {approx = true} : vector<8x1xf32> -> vector<8x1xf32>
    %68 = vector.broadcast %67 : vector<8x1xf32> to vector<8x8xf32>
    %69 = arith.mulf %64, %68 : vector<8x8xf32>
    %70 = arith.truncf %69 : vector<8x8xf32> to vector<8x8xbf16>
    %cst_25 = arith.constant dense<0.000000e+00> : vector<8x32xf32>
    %71 = tpu.matmul %70, %56, %cst_25 {dimension_numbers = #tpu.dot_dimension_numbers<[1], [0], [0], [1], [0, 0, 1, 1], [], []>} : vector<8x8xbf16>, vector<8x32xbf16>, vector<8x32xf32> -> vector<8x32xf32>
    %72 = vector.extract_strided_slice %42 {offsets = [0, 32], sizes = [8, 32], strides = [1, 1]} : vector<8x128xf32> to vector<8x32xf32>
    %73 = arith.truncf %72 : vector<8x32xf32> to vector<8x32xbf16>
    %74 = vector.extract_strided_slice %43 {offsets = [0, 32], sizes = [8, 32], strides = [1, 1]} : vector<8x128xf32> to vector<8x32xf32>
    %75 = arith.truncf %74 : vector<8x32xf32> to vector<8x32xbf16>
    %76 = vector.extract_strided_slice %44 {offsets = [0, 32], sizes = [8, 32], strides = [1, 1]} : vector<8x128xf32> to vector<8x32xf32>
    %77 = arith.truncf %76 : vector<8x32xf32> to vector<8x32xbf16>
    %cst_26 = arith.constant dense<0.000000e+00> : vector<8x8xf32>
    %78 = tpu.matmul %73, %75, %cst_26 {dimension_numbers = #tpu.dot_dimension_numbers<[1], [1], [0], [0], [0, 0, 1, 0], [], []>} : vector<8x32xbf16>, vector<8x32xbf16>, vector<8x8xf32> -> vector<8x8xf32>
    %79 = vector.broadcast %50 : vector<1x8xf32> to vector<8x8xf32>
    %80 = arith.addf %78, %79 : vector<8x8xf32>
    %cst_27 = arith.constant dense<0xFF800000> : vector<8xf32>
    %81 = vector.multi_reduction <maximumf>, %80, %cst_27 [1] : vector<8x8xf32> to vector<8xf32>
    %82 = vector.shape_cast %81 : vector<8xf32> to vector<8x1xf32>
    %83 = vector.broadcast %82 : vector<8x1xf32> to vector<8x8xf32>
    %84 = arith.subf %80, %83 : vector<8x8xf32>
    %85 = math.exp %84 : vector<8x8xf32>
    %cst_28 = arith.constant dense<0.000000e+00> : vector<8xf32>
    %86 = vector.multi_reduction <add>, %85, %cst_28 [1] : vector<8x8xf32> to vector<8xf32>
    %87 = vector.shape_cast %86 : vector<8xf32> to vector<8x1xf32>
    %88 = tpu.reciprocal %87 {approx = true} : vector<8x1xf32> -> vector<8x1xf32>
    %89 = vector.broadcast %88 : vector<8x1xf32> to vector<8x8xf32>
    %90 = arith.mulf %85, %89 : vector<8x8xf32>
    %91 = arith.truncf %90 : vector<8x8xf32> to vector<8x8xbf16>
    %cst_29 = arith.constant dense<0.000000e+00> : vector<8x32xf32>
    %92 = tpu.matmul %91, %77, %cst_29 {dimension_numbers = #tpu.dot_dimension_numbers<[1], [0], [0], [1], [0, 0, 1, 1], [], []>} : vector<8x8xbf16>, vector<8x32xbf16>, vector<8x32xf32> -> vector<8x32xf32>
    %93 = vector.extract_strided_slice %42 {offsets = [0, 64], sizes = [8, 32], strides = [1, 1]} : vector<8x128xf32> to vector<8x32xf32>
    %94 = arith.truncf %93 : vector<8x32xf32> to vector<8x32xbf16>
    %95 = vector.extract_strided_slice %43 {offsets = [0, 64], sizes = [8, 32], strides = [1, 1]} : vector<8x128xf32> to vector<8x32xf32>
    %96 = arith.truncf %95 : vector<8x32xf32> to vector<8x32xbf16>
    %97 = vector.extract_strided_slice %44 {offsets = [0, 64], sizes = [8, 32], strides = [1, 1]} : vector<8x128xf32> to vector<8x32xf32>
    %98 = arith.truncf %97 : vector<8x32xf32> to vector<8x32xbf16>
    %cst_30 = arith.constant dense<0.000000e+00> : vector<8x8xf32>
    %99 = tpu.matmul %94, %96, %cst_30 {dimension_numbers = #tpu.dot_dimension_numbers<[1], [1], [0], [0], [0, 0, 1, 0], [], []>} : vector<8x32xbf16>, vector<8x32xbf16>, vector<8x8xf32> -> vector<8x8xf32>
    %100 = vector.broadcast %50 : vector<1x8xf32> to vector<8x8xf32>
    %101 = arith.addf %99, %100 : vector<8x8xf32>
    %cst_31 = arith.constant dense<0xFF800000> : vector<8xf32>
    %102 = vector.multi_reduction <maximumf>, %101, %cst_31 [1] : vector<8x8xf32> to vector<8xf32>
    %103 = vector.shape_cast %102 : vector<8xf32> to vector<8x1xf32>
    %104 = vector.broadcast %103 : vector<8x1xf32> to vector<8x8xf32>
    %105 = arith.subf %101, %104 : vector<8x8xf32>
    %106 = math.exp %105 : vector<8x8xf32>
    %cst_32 = arith.constant dense<0.000000e+00> : vector<8xf32>
    %107 = vector.multi_reduction <add>, %106, %cst_32 [1] : vector<8x8xf32> to vector<8xf32>
    %108 = vector.shape_cast %107 : vector<8xf32> to vector<8x1xf32>
    %109 = tpu.reciprocal %108 {approx = true} : vector<8x1xf32> -> vector<8x1xf32>
    %110 = vector.broadcast %109 : vector<8x1xf32> to vector<8x8xf32>
    %111 = arith.mulf %106, %110 : vector<8x8xf32>
    %112 = arith.truncf %111 : vector<8x8xf32> to vector<8x8xbf16>
    %cst_33 = arith.constant dense<0.000000e+00> : vector<8x32xf32>
    %113 = tpu.matmul %112, %98, %cst_33 {dimension_numbers = #tpu.dot_dimension_numbers<[1], [0], [0], [1], [0, 0, 1, 1], [], []>} : vector<8x8xbf16>, vector<8x32xbf16>, vector<8x32xf32> -> vector<8x32xf32>
    %114 = vector.extract_strided_slice %42 {offsets = [0, 96], sizes = [8, 32], strides = [1, 1]} : vector<8x128xf32> to vector<8x32xf32>
    %115 = arith.truncf %114 : vector<8x32xf32> to vector<8x32xbf16>
    %116 = vector.extract_strided_slice %43 {offsets = [0, 96], sizes = [8, 32], strides = [1, 1]} : vector<8x128xf32> to vector<8x32xf32>
    %117 = arith.truncf %116 : vector<8x32xf32> to vector<8x32xbf16>
    %118 = vector.extract_strided_slice %44 {offsets = [0, 96], sizes = [8, 32], strides = [1, 1]} : vector<8x128xf32> to vector<8x32xf32>
    %119 = arith.truncf %118 : vector<8x32xf32> to vector<8x32xbf16>
    %cst_34 = arith.constant dense<0.000000e+00> : vector<8x8xf32>
    %120 = tpu.matmul %115, %117, %cst_34 {dimension_numbers = #tpu.dot_dimension_numbers<[1], [1], [0], [0], [0, 0, 1, 0], [], []>} : vector<8x32xbf16>, vector<8x32xbf16>, vector<8x8xf32> -> vector<8x8xf32>
    %121 = vector.broadcast %50 : vector<1x8xf32> to vector<8x8xf32>
    %122 = arith.addf %120, %121 : vector<8x8xf32>
    %cst_35 = arith.constant dense<0xFF800000> : vector<8xf32>
    %123 = vector.multi_reduction <maximumf>, %122, %cst_35 [1] : vector<8x8xf32> to vector<8xf32>
    %124 = vector.shape_cast %123 : vector<8xf32> to vector<8x1xf32>
    %125 = vector.broadcast %124 : vector<8x1xf32> to vector<8x8xf32>
    %126 = arith.subf %122, %125 : vector<8x8xf32>
    %127 = math.exp %126 : vector<8x8xf32>
    %cst_36 = arith.constant dense<0.000000e+00> : vector<8xf32>
    %128 = vector.multi_reduction <add>, %127, %cst_36 [1] : vector<8x8xf32> to vector<8xf32>
    %129 = vector.shape_cast %128 : vector<8xf32> to vector<8x1xf32>
    %130 = tpu.reciprocal %129 {approx = true} : vector<8x1xf32> -> vector<8x1xf32>
    %131 = vector.broadcast %130 : vector<8x1xf32> to vector<8x8xf32>
    %132 = arith.mulf %127, %131 : vector<8x8xf32>
    %133 = arith.truncf %132 : vector<8x8xf32> to vector<8x8xbf16>
    %cst_37 = arith.constant dense<0.000000e+00> : vector<8x32xf32>
    %134 = tpu.matmul %133, %119, %cst_37 {dimension_numbers = #tpu.dot_dimension_numbers<[1], [0], [0], [1], [0, 0, 1, 1], [], []>} : vector<8x8xbf16>, vector<8x32xbf16>, vector<8x32xf32> -> vector<8x32xf32>
    %135 = tpu.concatenate %71, %92, %113, %134 in 1 : vector<8x32xf32>, vector<8x32xf32>, vector<8x32xf32>, vector<8x32xf32> -> vector<8x128xf32>
    %c0_38 = arith.constant 0 : index
    %c0_39 = arith.constant 0 : index
    %c0_40 = arith.constant 0 : index
    %136 = vector.load %arg11[%c0_38, %c0_39, %c0_40] : memref<1x128x128xbf16, #tpu.memory_space<vmem>>, vector<1x128x128xbf16>
    %137 = vector.shape_cast %136 : vector<1x128x128xbf16> to vector<128x128xbf16>
    %138 = arith.truncf %135 : vector<8x128xf32> to vector<8x128xbf16>
    %cst_41 = arith.constant dense<0.000000e+00> : vector<8x128xf32>
    %139 = tpu.matmul %138, %137, %cst_41 {dimension_numbers = #tpu.dot_dimension_numbers<[1], [0], [0], [1], [0, 0, 1, 1], [], []>} : vector<8x128xbf16>, vector<128x128xbf16>, vector<8x128xf32> -> vector<8x128xf32>
    %140 = arith.addf %5, %139 : vector<8x128xf32>
    %c0_42 = arith.constant 0 : index
    %c0_43 = arith.constant 0 : index
    %c0_44 = arith.constant 0 : index
    %141 = vector.load %arg12[%c0_42, %c0_43, %c0_44] : memref<1x1x128xf32, #tpu.memory_space<vmem>>, vector<1x1x128xf32>
    %142 = vector.shape_cast %141 : vector<1x1x128xf32> to vector<1x128xf32>
    %143 = vector.broadcast %142 : vector<1x128xf32> to vector<8x128xf32>
    %144 = arith.addf %140, %143 : vector<8x128xf32>
    %c0_45 = arith.constant 0 : index
    %c0_46 = arith.constant 0 : index
    %c0_47 = arith.constant 0 : index
    %145 = vector.load %arg13[%c0_45, %c0_46, %c0_47] : memref<1x1x128xf32, #tpu.memory_space<vmem>>, vector<1x1x128xf32>
    %146 = vector.shape_cast %145 : vector<1x1x128xf32> to vector<1x128xf32>
    %c0_48 = arith.constant 0 : index
    %c0_49 = arith.constant 0 : index
    %c0_50 = arith.constant 0 : index
    %147 = vector.load %arg14[%c0_48, %c0_49, %c0_50] : memref<1x1x128xf32, #tpu.memory_space<vmem>>, vector<1x1x128xf32>
    %148 = vector.shape_cast %147 : vector<1x1x128xf32> to vector<1x128xf32>
    %cst_51 = arith.constant dense<0.000000e+00> : vector<8xf32>
    %149 = vector.multi_reduction <add>, %144, %cst_51 [1] : vector<8x128xf32> to vector<8xf32>
    %150 = vector.shape_cast %149 : vector<8xf32> to vector<8x1xf32>
    %cst_52 = arith.constant 1.280000e+02 : f32
    %151 = vector.broadcast %cst_52 : f32 to vector<8x1xf32>
    %152 = arith.divf %150, %151 : vector<8x1xf32>
    %153 = vector.broadcast %152 : vector<8x1xf32> to vector<8x128xf32>
    %154 = arith.subf %144, %153 : vector<8x128xf32>
    %155 = arith.mulf %154, %154 : vector<8x128xf32>
    %cst_53 = arith.constant dense<0.000000e+00> : vector<8xf32>
    %156 = vector.multi_reduction <add>, %155, %cst_53 [1] : vector<8x128xf32> to vector<8xf32>
    %157 = vector.shape_cast %156 : vector<8xf32> to vector<8x1xf32>
    %cst_54 = arith.constant 1.280000e+02 : f32
    %158 = vector.broadcast %cst_54 : f32 to vector<8x1xf32>
    %159 = arith.divf %157, %158 : vector<8x1xf32>
    %160 = vector.broadcast %152 : vector<8x1xf32> to vector<8x128xf32>
    %161 = arith.subf %144, %160 : vector<8x128xf32>
    %cst_55 = arith.constant 9.99999974E-6 : f32
    %162 = vector.broadcast %cst_55 : f32 to vector<8x1xf32>
    %163 = arith.addf %159, %162 : vector<8x1xf32>
    %164 = math.rsqrt %163 : vector<8x1xf32>
    %165 = vector.broadcast %164 : vector<8x1xf32> to vector<8x128xf32>
    %166 = arith.mulf %161, %165 : vector<8x128xf32>
    %167 = vector.broadcast %146 : vector<1x128xf32> to vector<8x128xf32>
    %168 = arith.mulf %166, %167 : vector<8x128xf32>
    %169 = vector.broadcast %148 : vector<1x128xf32> to vector<8x128xf32>
    %170 = arith.addf %168, %169 : vector<8x128xf32>
    %c0_56 = arith.constant 0 : index
    %c0_57 = arith.constant 0 : index
    %c0_58 = arith.constant 0 : index
    %171 = vector.load %arg15[%c0_56, %c0_57, %c0_58] : memref<1x128x512xbf16, #tpu.memory_space<vmem>>, vector<1x128x512xbf16>
    %172 = vector.shape_cast %171 : vector<1x128x512xbf16> to vector<128x512xbf16>
    %173 = arith.truncf %170 : vector<8x128xf32> to vector<8x128xbf16>
    %cst_59 = arith.constant dense<0.000000e+00> : vector<8x512xf32>
    %174 = tpu.matmul %173, %172, %cst_59 {dimension_numbers = #tpu.dot_dimension_numbers<[1], [0], [0], [1], [0, 0, 1, 1], [], []>} : vector<8x128xbf16>, vector<128x512xbf16>, vector<8x512xf32> -> vector<8x512xf32>
    %c0_60 = arith.constant 0 : index
    %c0_61 = arith.constant 0 : index
    %c0_62 = arith.constant 0 : index
    %175 = vector.load %arg16[%c0_60, %c0_61, %c0_62] : memref<1x1x512xf32, #tpu.memory_space<vmem>>, vector<1x1x512xf32>
    %176 = vector.shape_cast %175 : vector<1x1x512xf32> to vector<1x512xf32>
    %177 = vector.broadcast %176 : vector<1x512xf32> to vector<8x512xf32>
    %178 = arith.addf %174, %177 : vector<8x512xf32>
    %cst_63 = arith.constant 1.702000e+00 : f32
    %179 = vector.broadcast %cst_63 : f32 to vector<8x512xf32>
    %180 = arith.mulf %179, %178 : vector<8x512xf32>
    %181 = arith.negf %180 : vector<8x512xf32>
    %182 = math.exp %181 : vector<8x512xf32>
    %cst_64 = arith.constant 1.000000e+00 : f32
    %183 = vector.broadcast %cst_64 : f32 to vector<8x512xf32>
    %184 = arith.addf %183, %182 : vector<8x512xf32>
    %185 = arith.divf %183, %184 : vector<8x512xf32>
    %186 = arith.mulf %178, %185 : vector<8x512xf32>
    %c0_65 = arith.constant 0 : index
    %c0_66 = arith.constant 0 : index
    %c0_67 = arith.constant 0 : index
    %187 = vector.load %arg17[%c0_65, %c0_66, %c0_67] : memref<1x512x128xbf16, #tpu.memory_space<vmem>>, vector<1x512x128xbf16>
    %188 = vector.shape_cast %187 : vector<1x512x128xbf16> to vector<512x128xbf16>
    %189 = arith.truncf %186 : vector<8x512xf32> to vector<8x512xbf16>
    %cst_68 = arith.constant dense<0.000000e+00> : vector<8x128xf32>
    %190 = tpu.matmul %189, %188, %cst_68 {dimension_numbers = #tpu.dot_dimension_numbers<[1], [0], [0], [1], [0, 0, 1, 1], [], []>} : vector<8x512xbf16>, vector<512x128xbf16>, vector<8x128xf32> -> vector<8x128xf32>
    %191 = arith.addf %144, %190 : vector<8x128xf32>
    %c0_69 = arith.constant 0 : index
    %c0_70 = arith.constant 0 : index
    %c0_71 = arith.constant 0 : index
    %192 = vector.load %arg18[%c0_69, %c0_70, %c0_71] : memref<1x1x128xf32, #tpu.memory_space<vmem>>, vector<1x1x128xf32>
    %193 = vector.shape_cast %192 : vector<1x1x128xf32> to vector<1x128xf32>
    %194 = vector.broadcast %193 : vector<1x128xf32> to vector<8x128xf32>
    %195 = arith.addf %191, %194 : vector<8x128xf32>
    %196 = arith.index_cast %arg1 : i32 to index
    %c0_72 = arith.constant 0 : index
    %c0_73 = arith.constant 0 : index
    %197 = vector.load %arg24[%196, %c0_72, %c0_73] : memref<4x8x128xf32, #tpu.memory_space<vmem>>, vector<1x8x128xf32>
    %198 = vector.shape_cast %197 : vector<1x8x128xf32> to vector<8x128xf32>
    %199 = vector.shape_cast %195 : vector<8x128xf32> to vector<1x8x128xf32>
    tpu.vector_store %arg24[%196, %c0_72, %c0_73], %199 {strides = array<i32>} : memref<4x8x128xf32, #tpu.memory_space<vmem>>, vector<1x8x128xf32>,
    %c1_i32 = arith.constant 1 : i32
    %200 = arith.cmpi eq, %arg0, %c1_i32 : i32
    %201 = arith.extui %200 : i1 to i32
    %c0_i32_74 = arith.constant 0 : i32
    %202 = arith.cmpi ne, %201, %c0_i32_74 : i32
    scf.if %202 {
      %203 = vector.extract_strided_slice %195 {offsets = [0, 0], sizes = [1, 128], strides = [1, 1]} : vector<8x128xf32> to vector<1x128xf32>
      %c0_75 = arith.constant 0 : index
      %c0_76 = arith.constant 0 : index
      %204 = vector.load %arg19[%c0_75, %c0_76] : memref<1x128xf32, #tpu.memory_space<vmem>>, vector<1x128xf32>
      %c0_77 = arith.constant 0 : index
      %c0_78 = arith.constant 0 : index
      %205 = vector.load %arg20[%c0_77, %c0_78] : memref<1x128xf32, #tpu.memory_space<vmem>>, vector<1x128xf32>
      %cst_79 = arith.constant dense<0.000000e+00> : vector<1xf32>
      %206 = vector.multi_reduction <add>, %203, %cst_79 [1] : vector<1x128xf32> to vector<1xf32>
      %207 = vector.shape_cast %206 : vector<1xf32> to vector<1x1xf32>
      %cst_80 = arith.constant 1.280000e+02 : f32
      %208 = vector.broadcast %cst_80 : f32 to vector<1x1xf32>
      %209 = arith.divf %207, %208 : vector<1x1xf32>
      %210 = vector.broadcast %209 : vector<1x1xf32> to vector<1x128xf32>
      %211 = arith.subf %203, %210 : vector<1x128xf32>
      %212 = arith.mulf %211, %211 : vector<1x128xf32>
      %cst_81 = arith.constant dense<0.000000e+00> : vector<1xf32>
      %213 = vector.multi_reduction <add>, %212, %cst_81 [1] : vector<1x128xf32> to vector<1xf32>
      %214 = vector.shape_cast %213 : vector<1xf32> to vector<1x1xf32>
      %cst_82 = arith.constant 1.280000e+02 : f32
      %215 = vector.broadcast %cst_82 : f32 to vector<1x1xf32>
      %216 = arith.divf %214, %215 : vector<1x1xf32>
      %217 = vector.broadcast %209 : vector<1x1xf32> to vector<1x128xf32>
      %218 = arith.subf %203, %217 : vector<1x128xf32>
      %cst_83 = arith.constant 9.99999974E-6 : f32
      %219 = vector.broadcast %cst_83 : f32 to vector<1x1xf32>
      %220 = arith.addf %216, %219 : vector<1x1xf32>
      %221 = math.rsqrt %220 : vector<1x1xf32>
      %222 = vector.broadcast %221 : vector<1x1xf32> to vector<1x128xf32>
      %223 = arith.mulf %218, %222 : vector<1x128xf32>
      %224 = arith.mulf %223, %204 : vector<1x128xf32>
      %225 = arith.addf %224, %205 : vector<1x128xf32>
      %c0_84 = arith.constant 0 : index
      %c0_85 = arith.constant 0 : index
      %226 = vector.load %arg21[%c0_84, %c0_85] : memref<128x64xbf16, #tpu.memory_space<vmem>>, vector<128x64xbf16>
      %227 = arith.truncf %225 : vector<1x128xf32> to vector<1x128xbf16>
      %cst_86 = arith.constant dense<0.000000e+00> : vector<1x64xf32>
      %228 = tpu.matmul %227, %226, %cst_86 {dimension_numbers = #tpu.dot_dimension_numbers<[1], [0], [0], [1], [0, 0, 1, 1], [], []>} : vector<1x128xbf16>, vector<128x64xbf16>, vector<1x64xf32> -> vector<1x64xf32>
      %c0_87 = arith.constant 0 : index
      %c0_88 = arith.constant 0 : index
      %229 = vector.load %arg22[%c0_87, %c0_88] : memref<1x64xf32, #tpu.memory_space<vmem>>, vector<1x64xf32>
      %230 = arith.addf %228, %229 : vector<1x64xf32>
      %c0_89 = arith.constant 0 : index
      %c0_90 = arith.constant 0 : index
      %c0_91 = arith.constant 0 : index
      %231 = vector.load %arg23[%c0_89, %c0_90, %c0_91] : memref<1x1x64xf32, #tpu.memory_space<vmem>>, vector<1x1x64xf32>
      %232 = vector.shape_cast %231 : vector<1x1x64xf32> to vector<1x64xf32>
      %233 = vector.shape_cast %230 : vector<1x64xf32> to vector<1x1x64xf32>
      tpu.vector_store %arg23[%c0_89, %c0_90, %c0_91], %233 {strides = array<i32>} : memref<1x1x64xf32, #tpu.memory_space<vmem>>, vector<1x1x64xf32>,
    } else {
    }
    return
  }
  func.func @transform_0(%arg0: i32, %arg1: i32) -> (i32, i32, i32) {
    %c0_i32 = arith.constant 0 : i32
    %0 = arith.cmpi eq, %arg0, %c0_i32 : i32
    %c0_i32_0 = arith.constant 0 : i32
    %1 = arith.select %0, %arg1, %c0_i32_0 : i32
    %c0_i32_1 = arith.constant 0 : i32
    %c0_i32_2 = arith.constant 0 : i32
    %c0_i32_3 = arith.constant 0 : i32
    return %1, %c0_i32_1, %c0_i32_2 : i32, i32, i32
  }
  func.func @transform_1(%arg0: i32, %arg1: i32) -> (i32, i32) {
    %c0_i32 = arith.constant 0 : i32
    %c0_i32_0 = arith.constant 0 : i32
    %c0_i32_1 = arith.constant 0 : i32
    return %c0_i32, %c0_i32_0 : i32, i32
  }
  func.func @transform_2(%arg0: i32, %arg1: i32) -> (i32, i32) {
    %c0_i32 = arith.constant 0 : i32
    %c0_i32_0 = arith.constant 0 : i32
    %c0_i32_1 = arith.constant 0 : i32
    return %c0_i32, %c0_i32_0 : i32, i32
  }
  func.func @transform_3(%arg0: i32, %arg1: i32) -> (i32, i32) {
    %c0_i32 = arith.constant 0 : i32
    %c0_i32_0 = arith.constant 0 : i32
    %c0_i32_1 = arith.constant 0 : i32
    return %c0_i32, %c0_i32_0 : i32, i32
  }
  func.func @transform_4(%arg0: i32, %arg1: i32) -> (i32, i32) {
    %c0_i32 = arith.constant 0 : i32
    %c0_i32_0 = arith.constant 0 : i32
    %c0_i32_1 = arith.constant 0 : i32
    return %c0_i32, %c0_i32_0 : i32, i32
  }
  func.func @transform_5(%arg0: i32, %arg1: i32) -> (i32, i32, i32) {
    %c0_i32 = arith.constant 0 : i32
    %c0_i32_0 = arith.constant 0 : i32
    %c0_i32_1 = arith.constant 0 : i32
    return %arg0, %c0_i32, %c0_i32_0 : i32, i32, i32
  }
  func.func @transform_6(%arg0: i32, %arg1: i32) -> (i32, i32, i32) {
    %c0_i32 = arith.constant 0 : i32
    %c0_i32_0 = arith.constant 0 : i32
    %c0_i32_1 = arith.constant 0 : i32
    return %arg0, %c0_i32, %c0_i32_0 : i32, i32, i32
  }
  func.func @transform_7(%arg0: i32, %arg1: i32) -> (i32, i32, i32) {
    %c0_i32 = arith.constant 0 : i32
    %c0_i32_0 = arith.constant 0 : i32
    %c0_i32_1 = arith.constant 0 : i32
    return %arg0, %c0_i32, %c0_i32_0 : i32, i32, i32
  }
  func.func @transform_8(%arg0: i32, %arg1: i32) -> (i32, i32, i32) {
    %c0_i32 = arith.constant 0 : i32
    %c0_i32_0 = arith.constant 0 : i32
    %c0_i32_1 = arith.constant 0 : i32
    return %arg0, %c0_i32, %c0_i32_0 : i32, i32, i32
  }
  func.func @transform_9(%arg0: i32, %arg1: i32) -> (i32, i32, i32) {
    %c0_i32 = arith.constant 0 : i32
    %c0_i32_0 = arith.constant 0 : i32
    %c0_i32_1 = arith.constant 0 : i32
    return %arg0, %c0_i32, %c0_i32_0 : i32, i32, i32
  }
  func.func @transform_10(%arg0: i32, %arg1: i32) -> (i32, i32, i32) {
    %c0_i32 = arith.constant 0 : i32
    %c0_i32_0 = arith.constant 0 : i32
    %c0_i32_1 = arith.constant 0 : i32
    return %arg0, %c0_i32, %c0_i32_0 : i32, i32, i32
  }
  func.func @transform_11(%arg0: i32, %arg1: i32) -> (i32, i32, i32) {
    %c0_i32 = arith.constant 0 : i32
    %c0_i32_0 = arith.constant 0 : i32
    %c0_i32_1 = arith.constant 0 : i32
    return %arg0, %c0_i32, %c0_i32_0 : i32, i32, i32
  }
  func.func @transform_12(%arg0: i32, %arg1: i32) -> (i32, i32, i32) {
    %c0_i32 = arith.constant 0 : i32
    %c0_i32_0 = arith.constant 0 : i32
    %c0_i32_1 = arith.constant 0 : i32
    return %arg0, %c0_i32, %c0_i32_0 : i32, i32, i32
  }
  func.func @transform_13(%arg0: i32, %arg1: i32) -> (i32, i32, i32) {
    %c0_i32 = arith.constant 0 : i32
    %c0_i32_0 = arith.constant 0 : i32
    %c0_i32_1 = arith.constant 0 : i32
    return %arg0, %c0_i32, %c0_i32_0 : i32, i32, i32
  }
  func.func @transform_14(%arg0: i32, %arg1: i32) -> (i32, i32, i32) {
    %c0_i32 = arith.constant 0 : i32
    %c0_i32_0 = arith.constant 0 : i32
    %c0_i32_1 = arith.constant 0 : i32
    return %arg0, %c0_i32, %c0_i32_0 : i32, i32, i32
  }
  func.func @transform_15(%arg0: i32, %arg1: i32) -> (i32, i32, i32) {
    %c0_i32 = arith.constant 0 : i32
    %c0_i32_0 = arith.constant 0 : i32
    %c0_i32_1 = arith.constant 0 : i32
    return %arg0, %c0_i32, %c0_i32_0 : i32, i32, i32
  }
  func.func @transform_16(%arg0: i32, %arg1: i32) -> (i32, i32, i32) {
    %c0_i32 = arith.constant 0 : i32
    %c0_i32_0 = arith.constant 0 : i32
    %c0_i32_1 = arith.constant 0 : i32
    return %arg0, %c0_i32, %c0_i32_0 : i32, i32, i32
  }
  func.func @transform_17(%arg0: i32, %arg1: i32) -> (i32, i32) {
    %c0_i32 = arith.constant 0 : i32
    %c0_i32_0 = arith.constant 0 : i32
    %c0_i32_1 = arith.constant 0 : i32
    return %c0_i32, %c0_i32_0 : i32, i32
  }
  func.func @transform_18(%arg0: i32, %arg1: i32) -> (i32, i32) {
    %c0_i32 = arith.constant 0 : i32
    %c0_i32_0 = arith.constant 0 : i32
    %c0_i32_1 = arith.constant 0 : i32
    return %c0_i32, %c0_i32_0 : i32, i32
  }
  func.func @transform_19(%arg0: i32, %arg1: i32) -> (i32, i32) {
    %c0_i32 = arith.constant 0 : i32
    %c0_i32_0 = arith.constant 0 : i32
    %c0_i32_1 = arith.constant 0 : i32
    return %c0_i32, %c0_i32_0 : i32, i32
  }
  func.func @transform_20(%arg0: i32, %arg1: i32) -> (i32, i32) {
    %c0_i32 = arith.constant 0 : i32
    %c0_i32_0 = arith.constant 0 : i32
    %c0_i32_1 = arith.constant 0 : i32
    return %c0_i32, %c0_i32_0 : i32, i32
  }
  func.func @transform_21(%arg0: i32, %arg1: i32) -> (i32, i32, i32) {
    %c0_i32 = arith.constant 0 : i32
    %c0_i32_0 = arith.constant 0 : i32
    %c0_i32_1 = arith.constant 0 : i32
    return %arg1, %c0_i32, %c0_i32_0 : i32, i32, i32
  }
}

</mosaic_0001>

<bundles_post_ra>
// kernel: clip_image_encoder_forward.1
= control target key start
LH: loop header
LB: loop body
LE: loop exit
PB: predicated region body
PF: predicated region fallthrough
CT: control target
= control target key end

     0   :  { %s5296_s0 = inlined_call_operand.vmem [shape: bf16[4,8,256], index: 0, kind: input, shape index: {}]   ;;  %s5297_s1 = inlined_call_operand.vmem [shape: bf16[256,128], index: 1, kind: input, shape index: {}]   ;;  %s5298_s2 = inlined_call_operand.vmem [shape: f32[8,128], index: 2, kind: input, shape index: {}]   ;;  %s5299_s3 = inlined_call_operand.vmem [shape: f32[1,128], index: 3, kind: input, shape index: {}]   ;;  %s5300_s4 = inlined_call_operand.hbm [shape: f32[1,128], index: 4, kind: input, shape index: {}]   ;;  %s5301_s5 = inlined_call_operand.hbm [shape: f32[2,1,128], index: 5, kind: input, shape index: {}]   ;;  %s5302_s6 = inlined_call_operand.hbm [shape: f32[2,1,128], index: 6, kind: input, shape index: {}]   ;;  %s5303_s7 = inlined_call_operand.hbm [shape: bf16[2,128,384], index: 7, kind: input, shape index: {}]   ;;  %s5304_s8 = inlined_call_operand.vmem [shape: f32[2,1,384], index: 8, kind: input, shape index: {}]   ;;  %s5305_s9 = inlined_call_operand.vmem [shape: bf16[2,128,128], index: 9, kind: input, shape index: {}]   ;;  %s5306_s10 = inlined_call_operand.vmem [shape: f32[2,1,128], index: 10, kind: input, shape index: {}]   ;;  %s5307_s11 = inlined_call_operand.hbm [shape: f32[2,1,128], index: 11, kind: input, shape index: {}]   ;;  %s5308_s12 = inlined_call_operand.hbm [shape: f32[2,1,128], index: 12, kind: input, shape index: {}]   ;;  %s5309_s13 = inlined_call_operand.vmem [shape: bf16[2,128,512], index: 13, kind: input, shape index: {}]   ;;  %s5310_s14 = inlined_call_operand.vmem [shape: f32[2,1,512], index: 14, kind: input, shape index: {}]   ;;  %s5311_s15 = inlined_call_operand.vmem [shape: bf16[2,512,128], index: 15, kind: input, shape index: {}]   ;;  %s5312_s16 = inlined_call_operand.hbm [shape: f32[2,1,128], index: 16, kind: input, shape index: {}]   ;;  %s5313_s17 = inlined_call_operand.hbm [shape: f32[1,128], index: 17, kind: input, shape index: {}]   ;;  %s5314_s18 = inlined_call_operand.hbm [shape: f32[1,128], index: 18, kind: input, shape index: {}]   ;;  %s5315_s19 = inlined_call_operand.vmem [shape: bf16[128,64], index: 19, kind: input, shape index: {}]   ;;  %s5316_s20 = inlined_call_operand.hbm [shape: f32[1,64], index: 20, kind: input, shape index: {}]   ;;  %s5317_s21 = inlined_call_operand.hbm [shape: f32[4,1,64], index: 21, kind: output, shape index: {}]  }
   0x1   :  { %5345 = sst [smem:[#allocation44_spill]] %s5296_s0 }
   0x2   :  { %5346 = sst [smem:[#allocation45_spill]] %s5297_s1 }
   0x3   :  { %5347 = sst [smem:[#allocation46_spill]] %s5298_s2 }
   0x4   :  { %5348 = sst [smem:[#allocation47_spill]] %s5299_s3 }
   0x5   :  { %5349 = sst [smem:[#allocation48_spill]] %s5300_s4 }
   0x6   :  { %5350 = sst [smem:[#allocation49_spill]] %s5301_s5 }
   0x7   :  { %5351 = sst [smem:[#allocation50_spill]] %s5302_s6 }
   0x8   :  { %5352 = sst [smem:[#allocation51_spill]] %s5303_s7 }
   0x9   :  { %5353 = sst [smem:[#allocation52_spill]] %s5304_s8 }
   0xa   :  { %5354 = sst [smem:[#allocation53_spill]] %s5305_s9 }
   0xb   :  { %5355 = sst [smem:[#allocation54_spill]] %s5306_s10 }
   0xc   :  { %5356 = sst [smem:[#allocation55_spill]] %s5307_s11 }
   0xd   :  { %5357 = sst [smem:[#allocation56_spill]] %s5308_s12 }
   0xe   :  { %5358 = sst [smem:[#allocation57_spill]] %s5309_s13 }
   0xf   :  { %5359 = sst [smem:[#allocation58_spill]] %s5310_s14 }
  0x10   :  { %5360 = sst [smem:[#allocation59_spill]] %s5311_s15 }
  0x11   :  { %5361 = sst [smem:[#allocation60_spill]] %s5312_s16 }
  0x12   :  { %5362 = sst [smem:[#allocation61_spill]] %s5313_s17 }
  0x13   :  { %5363 = sst [smem:[#allocation62_spill]] %s5315_s19 }
  0x14   :  { %5364 = sst [smem:[#allocation63_spill]] %s5317_s21 }
  0x15   :  { %26 = vsyncpa [#allocation4], 0 }
  0x16   :  { %27 = vsyncpa [#allocation7], 0 }
  0x17   :  { %29 = vsyncpa [#allocation7 + $0x1], 0 }
  0x18   :  { %30 = vsyncpa [#allocation10], 0 }
  0x19   :  { %32 = vsyncpa [#allocation10 + $0x1], 0 }
  0x1a   :  { %33 = vsyncpa [#allocation13], 0 }
  0x1b   :  { %35 = vsyncpa [#allocation13 + $0x1], 0 }
  0x1c   :  { %36 = vsyncpa [#allocation16], 0 }
  0x1d   :  { %37 = vsyncpa [#allocation19], 0 }
  0x1e   :  { %38 = vsyncpa [#allocation5], 0 }
  0x1f   :  { %40 = vsyncpa [#allocation5 + $0x1], 0  ;;  %s4578_s2 = smov 0   ;;  %s4580_s25 = smov 0  }
  0x20   :  { %s4582_s26 = smov 0   ;;  %s4584_s27 = smov 0  }
  0x21   :  { %s4586_s3 = smov 0   ;;  %s4588_s28 = smov 0  }
  0x22   :  { %s4590_s29 = smov 0   ;;  %s4592_s0 = smov 0  }
  0x23   :  { %s4594_s4 = smov 0   ;;  %s4596_s30 = smov 0  }
  0x24   :  { %s4598_s5 = smov 0  }
  0x25 LB: > { %5365 = sst [smem:[#allocation28_spill]] %s4404_s2  ;;  %s4632_s22 = sadd.s32 4294967295, %s4444_s5   ;;  %s4444_s5 = sphi %s4598_s5, %s46_s5   ;;  %s4440_s30 = sphi %s4596_s30, %s5454_s30   ;;  %s4436_s4 = sphi %s4594_s4, %s5451_s4   ;;  %s4432_s0 = sphi %s4592_s0, %s5453_s0   ;;  %s4428_s29 = sphi %s4590_s29, %s5450_s29   ;;  %s4424_s28 = sphi %s4588_s28, %s5449_s28   ;;  %s4420_s3 = sphi %s4586_s3, %s5448_s3   ;;  %s4416_s27 = sphi %s4584_s27, %s5447_s27   ;;  %s4412_s26 = sphi %s4582_s26, %s5446_s26   ;;  %s4408_s25 = sphi %s4580_s25, %s5445_s25   ;;  %s4404_s2 = sphi %s4578_s2, %s5444_s2  }
  0x26   : > { %5366 = sst [smem:[#allocation29_spill]] %s4408_s25  ;;  %s3266_s23 = sadd.s32 4294967294, %s4444_s5  }
  0x27   : > { %5367 = sst [smem:[#allocation30_spill]] %s4412_s26  ;;  %p192_p0 = scmp.ne.s32.totalorder %s4420_s3, %s4416_s27 }
  0x28   : > { %5368 = sst [smem:[#allocation31_spill]] %s4420_s3  ;;  %p5332_p1 = scmp.eq.s32.totalorder %s4632_s22, 0 }
  0x29   : > { %5369 = sst [smem:[#allocation32_spill]] %s4424_s28  ;;  %p585_p2 = scmp.ne.s32.totalorder %s4412_s26, %s4408_s25 }
  0x2a   : > { %5370 = sst [smem:[#allocation33_spill]] %s4428_s29  ;;  %p4642_p3 = por %p5332_p1, %p192_p0 }
  0x2b   : > { %5371 = sst [smem:[#allocation34_spill]] %s4432_s0  ;;  %p586_p4 = scmp.eq.s32.totalorder %s4632_s22, 7 }
  0x2c   : > { %5372 = sst [smem:[#allocation35_spill]] %s4436_s4  ;;  %p591_p5 = scmp.ne.s32.totalorder %s4408_s25, %s4404_s2 }
  0x2d   : > { %5373 = sst [smem:[#allocation36_spill]] %s4444_s5  ;;  %p592_p6 = scmp.eq.s32.totalorder %s3266_s23, 7 }
  0x2e   : > { %s5374_s24 = scalar_select %p4642_p3, 1, 0 }
  0x2f   : > { %p4649_p7 = por %p586_p4, %p585_p2  ;;  %p3267_p8 = scmp.ge.s32.totalorder %s4444_s5, 1 }
  0x30   : > { %5375 = sst [smem:[#allocation37_spill]] %s5374_s24  ;;  %p4654_p9 = por %p592_p6, %p591_p5 }
  0x31   : > { %s5376_s21 = scalar_select %p4649_p7, 1, 0 }
  0x32   : > { %s5378_s27 = scalar_select %p4654_p9, 1, 0 }
  0x33   : > { %5377 = sst [smem:[#allocation38_spill]] %s5376_s21  ;;  %p599_p10 = scmp.lt.s32.totalorder %s4444_s5, 9 }
  0x34   : > { %5379 = sst [smem:[#allocation39_spill]] %s5378_s27  ;;  %s4446_s19 = smov [#allocation15]  }
  0x35   : > { %p4659_p11 = pnand %p3267_p8, %p599_p10  ;;  %s632_s15 = sshll.u32 %s4446_s19, 4  ;;  %s633_s15 = int_to_ptr.vmem [resolvable:$true] %s632_s15 }
  0x36   : > { %s55_s2 = sadd.s32 1, %s4436_s4  ;;  %s4043_s27 = scalar_lea.vmem %s633_s15, 16 }
  0x37   : > { %s5380_s1 = scalar_select %p4659_p11, 1, 0 }
  0x38   : > { %p3697_p12 = pneg %p4659_p11  ;;  %p4044_p2 = scmp.ne.s32.totalorder %s633_s15, %s4043_s27 }
  0x39   : > { %s4050_s19 = scalar_lea.vmem %s633_s15, 32  ;;  %p4051_p6 = scmp.lt.s32.totalorder %s633_s15, %s633_s15 }
  0x3a   : > { %p4667_p13 = pnand %p3697_p12, %p5332_p1  ;;  %p4052_p8 = scmp.lt.s32.totalorder %s4050_s19, %s4043_s27 }
  0x3c   : > { %p4034_p0 = pneg %p4667_p13  ;;  %p4053_p10 = por %p4052_p8, %p4051_p6 }
  0x3e   : > { %p4046_p4 = pnand %p4044_p2, %p4034_p0 }
  0x40   : > { %p4047_p5 = pneg %p4046_p4 }
  0x42   : > { %p4054_p9 = pnand %p4053_p10, %p4047_p5 }
  0x44   : > { %4057 = shalt.err (!%p4054_p9)
}
  0x45   : > { %s5382_s17 = sld [smem:[#allocation61_spill]]  ;;  %p56_p12 = scmp.ge.s32.totalorder %s55_s2, 4 }
  0x46   : > { %s58_s27 = sadd.s32 1, %s4440_s30  ;;  %s179_s19 = sadd.s32 1, %s4424_s28 }
  0x47   : > { %p186_p9 = scmp.ne.s32.totalorder %s4424_s28, %s4420_s3  ;;  %s5456_s2 = smov (%p56_p12, %s55_s2), 0 }
  0x48   : > { %5383 = sst [smem:[#allocation40_spill]] %s5456_s2  ;;  %s5458_s27 = smov (!%p56_p12, %s58_s27), %s4440_s30 }
  0x49   : > { %p187_p2 = scmp.eq.s32.totalorder %s4444_s5, 0  ;;  %s572_s14 = ssub.s32 %s4436_s4, %s5456_s2 }
  0x4a   : > { %p60_p4 = scmp.ge.s32.totalorder %s5458_s27, 2  ;;  %p573_p5 = scmp.eq.s32.totalorder %s572_s14, 0 }
  0x4b   : > { %3703 = dma.hbm_to_vmem [thread:$0]  (!%p4667_p13), %s5382_s17, 16, %s633_s15, [#allocation16]  }
  0x4c   : > { %p4692_p6 = por %p187_p2, %p186_p9  ;;  %p3737_p8 = scmp.lt.s32.totalorder %s4444_s5, 8 }
  0x4d   : > { %s5460_s27 = smov (%p60_p4, %s5458_s27), 0  ;;  %s5386_s15 = sadd.s32 1, %s4412_s26 }
  0x4e   : > { %5385 = sst [smem:[#allocation41_spill]] %s5460_s27  ;;  %s176_s13 = ssub.s32 %s4440_s30, %s5460_s27 }
  0x4f   : > { %s4702_s17 = scalar_select %p573_p5, %s4412_s26, %s5386_s15  }
  0x50   : > { %s4707_s10 = sand.u32 1, %s4444_s5   ;;  %p177_p10 = scmp.eq.s32.totalorder %s176_s13, 0 }
  0x51   : > { %5387 = sst [smem:[#allocation42_spill]] %s4702_s17  ;;  %s4710_s2 = sand.u32 1, %s4424_s28  }
  0x52   : > { %s4713_s14 = sshll.u32 %s4440_s30, 4  ;;  %s5389_s29 = sld [smem:[#allocation49_spill]] }
  0x53   : > { %s4716_s4 = scalar_select %p177_p10, %s4424_s28, %s179_s19  }
  0x54   : > { %s683_s15 = scalar_lea.vmem [#allocation6], %s4710_s2  ;;  %p4725_p12 = pnand %p3737_p8, %p4692_p6 }
  0x55   : > { %5388 = sst [smem:[#allocation43_spill]] %s4716_s4  ;;  %s690_s17 = sshll.u32 %s683_s15, 4  ;;  %s691_s17 = int_to_ptr.vmem [resolvable:$true] %s690_s17 }
  0x56   : > { %s5390_s27 = scalar_select %p4725_p12, 1, 0 }
  0x57   : > { %s3663_s13 = smul.u32 192, %s4710_s2  ;;  %s5339_s26 = scalar_lea.sflag [#allocation7], %s4707_s10 }
  0x58   : > { %s688_s0 = scalar_lea.hbm %s5389_s29, %s4713_s14  ;;  %p4733_p9 = pneg %p4725_p12 }
  0x59   : > { %s4071_s19 = scalar_lea.vmem %s691_s17, 16  ;;  %s4447_s8 = smov [#allocation6]  }
  0x5a   : > { %p4072_p2 = scmp.ne.s32.totalorder %s691_s17, %s4071_s19  ;;  %s4076_s9 = sshll.u32 %s4447_s8, 4  ;;  %s4077_s9 = int_to_ptr.vmem [resolvable:$false] %s4076_s9 }
  0x5b   : > { %s4078_s29 = scalar_lea.vmem %s4077_s9, 32  ;;  %p4079_p6 = scmp.lt.s32.totalorder %s691_s17, %s4077_s9 }
  0x5c   : > { %p4074_p4 = pnand %p4072_p2, %p4733_p9  ;;  %p4080_p8 = scmp.lt.s32.totalorder %s4078_s29, %s4071_s19 }
  0x5e   : > { %p4075_p5 = pneg %p4074_p4  ;;  %p4081_p10 = por %p4080_p8, %p4079_p6 }
  0x60   : > { %p4082_p1 = pnand %p4081_p10, %p4075_p5 }
  0x62   : > { %4085 = shalt.err (!%p4082_p1)
}
  0x63   : > { %3713 = dma.hbm_to_vmem [thread:$0]  (!%p4725_p12), %s688_s0, 16, %s691_s17, %s5339_s26  }
  0x64   : > { %s3664_s21 = smul.u32 3072, %s4440_s30  ;;  %s718_s15 = scalar_lea.vmem [#allocation9], %s3663_s13 }
  0x65   : > { %s725_s4 = sshll.u32 %s718_s15, 4  ;;  %s5392_s7 = sld [smem:[#allocation51_spill]]  ;;  %s726_s4 = int_to_ptr.vmem [resolvable:$true] %s725_s4 }
  0x66   : > { %s715_s19 = scalar_lea.sflag [#allocation10], %s4707_s10  ;;  %s4099_s9 = scalar_lea.vmem %s726_s4, 3072 }
  0x67   : > { %p4100_p2 = scmp.ne.s32.totalorder %s726_s4, %s4099_s9  ;;  %s4448_s29 = smov [#allocation9]  }
  0x68   : > { %s4104_s24 = sshll.u32 %s4448_s29, 4  ;;  %s4105_s24 = int_to_ptr.vmem [resolvable:$false] %s4104_s24 }
  0x69   : > { %p4102_p1 = pnand %p4100_p2, %p4733_p9  ;;  %s4106_s3 = scalar_lea.vmem %s4105_s24, 6144 }
  0x6a   : > { %p4107_p5 = scmp.lt.s32.totalorder %s726_s4, %s4105_s24  ;;  %p4108_p6 = scmp.lt.s32.totalorder %s4106_s3, %s4099_s9 }
  0x6b   : > { %s724_s25 = scalar_lea.hbm %s5392_s7, %s3664_s21  ;;  %p4103_p4 = pneg %p4102_p1 }
  0x6c   : > { %p4109_p8 = por %p4108_p6, %p4107_p5 }
  0x6e   : > { %p4110_p10 = pnand %p4109_p8, %p4103_p4 }
  0x70   : > { %4113 = shalt.err (!%p4110_p10)
}
  0x71   : > { %s4449_s17 = smov 192   ;;  %s4450_s28 = smov 12  }
  0x72   : > { %3719 = dma.hbm_to_vmem [thread:$0]  (!%p4725_p12), %s724_s25, 3072, %s726_s4, %s715_s19, %s4449_s17, %s4449_s17, %s4450_s28  }
  0x73   : > { %s5393_s12 = sld [smem:[#allocation56_spill]]  ;;  %s776_s24 = scalar_lea.vmem [#allocation12], %s4710_s2 }
  0x74   : > { %s783_s3 = sshll.u32 %s776_s24, 4  ;;  %s774_s15 = scalar_lea.sflag [#allocation13], %s4707_s10  ;;  %s784_s3 = int_to_ptr.vmem [resolvable:$true] %s783_s3 }
  0x75   : > { %s4127_s8 = scalar_lea.vmem %s784_s3, 16  ;;  %s4451_s9 = smov [#allocation12]  }
  0x76   : > { %p4128_p2 = scmp.ne.s32.totalorder %s784_s3, %s4127_s8  ;;  %s4132_s29 = sshll.u32 %s4451_s9, 4  ;;  %s4133_s29 = int_to_ptr.vmem [resolvable:$false] %s4132_s29 }
  0x77   : > { %s4134_s26 = scalar_lea.vmem %s4133_s29, 32  ;;  %p4135_p5 = scmp.lt.s32.totalorder %s784_s3, %s4133_s29 }
  0x78   : > { %p4130_p1 = pnand %p4128_p2, %p4733_p9  ;;  %p4136_p6 = scmp.lt.s32.totalorder %s4134_s26, %s4127_s8 }
  0x79   : > { %s781_s21 = scalar_lea.hbm %s5393_s12, %s4713_s14 }
  0x7a   : > { %p4131_p4 = pneg %p4130_p1  ;;  %p4137_p8 = por %p4136_p6, %p4135_p5 }
  0x7c   : > { %p4138_p10 = pnand %p4137_p8, %p4131_p4 }
  0x7e   : > { %4141 = shalt.err (!%p4138_p10)
}
  0x7f   : > { %3725 = dma.hbm_to_vmem [thread:$0]  (!%p4725_p12), %s781_s21, 16, %s784_s3, %s774_s15  }
  0x80   : > { %s4452_s25 = smov [#allocation3]   ;;  %s4453_s17 = smov [#allocation17]  }
  0x81   : > { %s621_s4 = sshll.u32 %s4452_s25, 4  ;;  %s643_s28 = sshll.u32 %s4453_s17, 4  ;;  %s622_s4 = int_to_ptr.vmem [resolvable:$true] %s621_s4  ;;  %s644_s28 = int_to_ptr.vmem [resolvable:$true] %s643_s28 }
  0x82   : > { %s4153_s0 = scalar_lea.vmem %s622_s4, 16  ;;  %s4160_s26 = scalar_lea.vmem %s622_s4, 32 }
  0x83   : > { %p4154_p2 = scmp.ne.s32.totalorder %s622_s4, %s4153_s0  ;;  %p4161_p4 = scmp.lt.s32.totalorder %s622_s4, %s622_s4 }
  0x84   : > { %p4162_p6 = scmp.lt.s32.totalorder %s4160_s26, %s4153_s0 }
  0x85   : > { %p4156_p1 = pnand %p4154_p2, %p4034_p0 }
  0x86   : > { %p4163_p8 = por %p4162_p6, %p4161_p4 }
  0x87   : > { %p4157_p5 = pneg %p4156_p1 }
  0x89   : > { %p4164_p10 = pnand %p4163_p8, %p4157_p5 }
  0x8b   : > { %4167 = shalt.err (!%p4164_p10)
}
  0x8c   : > { %s5394_s24 = sld [smem:[#allocation48_spill]]  ;;  %s4179_s3 = scalar_lea.vmem %s644_s28, 16 }
  0x8d   : > { %p4180_p7 = scmp.ne.s32.totalorder %s644_s28, %s4179_s3  ;;  %s4186_s8 = scalar_lea.vmem %s644_s28, 32 }
  0x8e   : > { %p4187_p1 = scmp.lt.s32.totalorder %s644_s28, %s644_s28  ;;  %p4188_p11 = scmp.lt.s32.totalorder %s4186_s8, %s4179_s3 }
  0x8f   : > { %p4182_p3 = pnand %p4180_p7, %p4034_p0 }
  0x90   : > { %p4189_p12 = por %p4188_p11, %p4187_p1 }
  0x91   : > { %p4183_p2 = pneg %p4182_p3 }
  0x92   : > { %3700 = dma.hbm_to_vmem [thread:$0]  (!%p4667_p13), %s5394_s24, 16, %s622_s4, [#allocation4]  }
  0x93   : > { %p4190_p4 = pnand %p4189_p12, %p4183_p2 }
  0x95   : > { %4193 = shalt.err (!%p4190_p4)
}
  0x96   : > { %3706 = dma.hbm_to_vmem [thread:$0]  (!%p4667_p13), %s5314_s18, 16, %s644_s28, [#allocation16]  }
  0x97   : > { %s4454_s25 = smov [#allocation18]   ;;  %s5395_s6 = sld [smem:[#allocation50_spill]] }
  0x98   : > { %s657_s4 = sshll.u32 %s4454_s25, 4  ;;  %s700_s13 = scalar_lea.vmem [#allocation8], %s4710_s2  ;;  %s658_s4 = int_to_ptr.vmem [resolvable:$true] %s657_s4 }
  0x99   : > { %s707_s21 = sshll.u32 %s700_s13, 4  ;;  %s4205_s24 = scalar_lea.vmem %s658_s4, 16  ;;  %s708_s21 = int_to_ptr.vmem [resolvable:$true] %s707_s21 }
  0x9a   : > { %p4206_p3 = scmp.ne.s32.totalorder %s658_s4, %s4205_s24  ;;  %s4212_s3 = scalar_lea.vmem %s658_s4, 32 }
  0x9b   : > { %p4213_p12 = scmp.lt.s32.totalorder %s658_s4, %s658_s4  ;;  %p4214_p5 = scmp.lt.s32.totalorder %s4212_s3, %s4205_s24 }
  0x9c   : > { %p4208_p7 = pnand %p4206_p3, %p4034_p0 }
  0x9d   : > { %s705_s26 = scalar_lea.hbm %s5395_s6, %s4713_s14  ;;  %p4215_p6 = por %p4214_p5, %p4213_p12 }
  0x9e   : > { %p4209_p11 = pneg %p4208_p7 }
  0xa0   : > { %p4216_p8 = pnand %p4215_p6, %p4209_p11 }
  0xa2   : > { %4219 = shalt.err (!%p4216_p8)
}
  0xa3   : > { %3709 = dma.hbm_to_vmem [thread:$0]  (!%p4667_p13), %s5316_s20, 16, %s658_s4, [#allocation19]  }
  0xa4   : > { %s4233_s9 = scalar_lea.vmem %s708_s21, 16  ;;  %s4455_s29 = smov [#allocation8]  }
  0xa5   : > { %p4234_p10 = scmp.ne.s32.totalorder %s708_s21, %s4233_s9  ;;  %s4238_s25 = sshll.u32 %s4455_s29, 4  ;;  %s4239_s25 = int_to_ptr.vmem [resolvable:$false] %s4238_s25 }
  0xa6   : > { %s4240_s17 = scalar_lea.vmem %s4239_s25, 32  ;;  %p4241_p1 = scmp.lt.s32.totalorder %s708_s21, %s4239_s25 }
  0xa7   : > { %p4236_p2 = pnand %p4234_p10, %p4733_p9  ;;  %p4242_p4 = scmp.lt.s32.totalorder %s4240_s17, %s4233_s9 }
  0xa9   : > { %p4237_p0 = pneg %p4236_p2  ;;  %p4243_p3 = por %p4242_p4, %p4241_p1 }
  0xab   : > { %p4244_p7 = pnand %p4243_p3, %p4237_p0 }
  0xad   : > { %4247 = shalt.err (!%p4244_p7)
}
  0xae   : > { %p5396_p11 = scmp.ne.s32.totalorder %s5390_s27, 0  ;;  %s5397_s23 = scalar_lea.sflag [#allocation7], %s4707_s10 }
  0xaf   : > { %s5398_s11 = sld [smem:[#allocation55_spill]]  ;;  %s759_s28 = scalar_lea.vmem [#allocation11], %s4710_s2 }
  0xb0   : > { %3716 = dma.hbm_to_vmem [thread:$0]  (!%p5396_p11), %s705_s26, 16, %s708_s21, %s5397_s23  }
  0xb1   : > { %s766_s8 = sshll.u32 %s759_s28, 4  ;;  %s4456_s29 = smov [#allocation11]   ;;  %s767_s8 = int_to_ptr.vmem [resolvable:$true] %s766_s8 }
  0xb2   : > { %s4261_s9 = scalar_lea.vmem %s767_s8, 16  ;;  %s4266_s25 = sshll.u32 %s4456_s29, 4  ;;  %s4267_s25 = int_to_ptr.vmem [resolvable:$false] %s4266_s25 }
  0xb3   : > { %p4262_p13 = scmp.ne.s32.totalorder %s767_s8, %s4261_s9  ;;  %s4268_s17 = scalar_lea.vmem %s4267_s25, 32 }
  0xb4   : > { %p4269_p6 = scmp.lt.s32.totalorder %s767_s8, %s4267_s25  ;;  %p4270_p8 = scmp.lt.s32.totalorder %s4268_s17, %s4261_s9 }
  0xb5   : > { %s764_s3 = scalar_lea.hbm %s5398_s11, %s4713_s14  ;;  %p4264_p12 = pnand %p4262_p13, %p4733_p9 }
  0xb6   : > { %p4271_p10 = por %p4270_p8, %p4269_p6 }
  0xb7   : > { %p4265_p5 = pneg %p4264_p12 }
  0xb9   : > { %p4272_p2 = pnand %p4271_p10, %p4265_p5 }
  0xbb   : > { %4275 = shalt.err (!%p4272_p2)
}
  0xbc   : > { %3722 = dma.hbm_to_vmem [thread:$0]  (!%p5396_p11), %s764_s3, 16, %s767_s8, %s715_s19  }
  0xbd   : > { %s5399_s16 = sld [smem:[#allocation60_spill]]  ;;  %s816_s4 = scalar_lea.vmem [#allocation14], %s4710_s2 }
  0xbe   : > { %s823_s0 = sshll.u32 %s816_s4, 4  ;;  %s4457_s24 = smov [#allocation14]   ;;  %s824_s0 = int_to_ptr.vmem [resolvable:$true] %s823_s0 }
  0xbf   : > { %s4289_s13 = scalar_lea.vmem %s824_s0, 16  ;;  %s4294_s28 = sshll.u32 %s4457_s24, 4  ;;  %s4295_s28 = int_to_ptr.vmem [resolvable:$false] %s4294_s28 }
  0xc0   : > { %p4290_p0 = scmp.ne.s32.totalorder %s824_s0, %s4289_s13  ;;  %s4296_s9 = scalar_lea.vmem %s4295_s28, 32 }
  0xc1   : > { %p4297_p3 = scmp.lt.s32.totalorder %s824_s0, %s4295_s28  ;;  %p4298_p7 = scmp.lt.s32.totalorder %s4296_s9, %s4289_s13 }
  0xc2   : > { %p4292_p1 = pnand %p4290_p0, %p4733_p9 }
  0xc3   : > { %s821_s23 = scalar_lea.hbm %s5399_s16, %s4713_s14  ;;  %p4299_p13 = por %p4298_p7, %p4297_p3 }
  0xc4   : > { %p4293_p4 = pneg %p4292_p1 }
  0xc6   : > { %p4300_p12 = pnand %p4299_p13, %p4293_p4 }
  0xc8   : > { %4303 = shalt.err (!%p4300_p12)
}
  0xc9   : > { %3728 = dma.hbm_to_vmem [thread:$0]  (!%p5396_p11), %s821_s23, 16, %s824_s0, %s774_s15  }
  0xca   : > { %p5400_p5 = scmp.ne.s32.totalorder %s5380_s1, 0 }
  0xcb   : > { %p5401_p9 = scmp.eq.s32.totalorder (!%p5400_p5), %s4632_s22, 0 }
  0xcc   : > { %832 = sbr.rel (%p5400_p5) target bundleno = 4156 (0x103c), region = 104 }
  0xd1   : > { %4375 = dma.done.wait (%p5401_p9), [#allocation4], 16   ;;  %p5402_p6 = pmov %p5401_p9 }
  0xd2   : > { %s5403_s2 = sld [smem:[#allocation31_spill]]  ;;  %s838_s14 = sand.u32 1, %s4632_s22  }
  0xd3   : > { %4377 = vsyncadd (%p5402_p6), [#allocation4], 4294967280  ;;  %s5404_s5 = sld [smem:[#allocation37_spill]]  ;;  %s839_s27 = scalar_lea.sflag [#allocation7], %s838_s14 }
  0xd8   : > { %s4836_s19 = sand.u32 1, %s5403_s2  }
  0xd9   : > { %p5405_p8 = scmp.ne.s32.totalorder %s5404_s5, 0 }
  0xdb   : > { %4379 = dma.done.wait (%p5405_p8), %s839_s27, 32  }
  0xdc   : > { %4381 = vsyncadd (%p5405_p8), %s839_s27, 4294967264  ;;  %s3665_s10 = smul.u32 192, %s4836_s19  ;;  %s855_s15 = scalar_lea.sflag [#allocation10], %s838_s14 }
  0xde   : > { %s4845_s8 = scalar_lea.vmem [#allocation9], %s3665_s10 }
  0xdf   : > { %4383 = dma.done.wait (%p5405_p8), %s855_s15, 3088  }
  0xe0   : > { %4385 = vsyncadd (%p5405_p8), %s855_s15, 4294964208  ;;  %s872_s25 = scalar_lea.sflag [#allocation13], %s838_s14 }
  0xe1   : > { %4387 = dma.done.wait (%p5405_p8), %s872_s25, 32  }
  0xe2   : > { %4389 = vsyncadd (%p5405_p8), %s872_s25, 4294967264  ;;  %p5406_p11 = pmov %p5402_p6 }
  0xe3   : > { %p5407_p10 = pmov %p5402_p6 }
  0xe4   : > { %4391 = dma.done.wait (%p5406_p11), [#allocation16], 32  }
  0xe5   : > { %4393 = vsyncadd (%p5407_p10), [#allocation16], 4294967264  ;;  %p5408_p2 = pmov %p5402_p6 }
  0xe7   : > { %4395 = dma.done.wait (%p5408_p2), [#allocation19], 16   ;;  %p5409_p0 = pmov %p5408_p2 }
  0xe8   : > { %s5410_s21 = sld [smem:[#allocation29_spill]] }
  0xe9   : > { %4397 = vsyncadd (%p5409_p0), [#allocation19], 4294967280  ;;  %s5411_s23 = sld [smem:[#allocation34_spill]] }
  0xea   : > { %s5412_s4 = sld [smem:[#allocation33_spill]] }
  0xeb   : > { %s5413_s2 = sld [smem:[#allocation52_spill]] }
  0xec   : > { %s5414_s10 = sld [smem:[#allocation53_spill]] }
  0xed   : > { %s5415_s29 = sld [smem:[#allocation54_spill]] }
  0xee   : > { %s5416_s6 = sld [smem:[#allocation44_spill]]  ;;  %s5420_s26 = sand.u32 1, %s5410_s21  }
  0xef   : > { %p1005_p1 = scmp.eq.s32.totalorder %s5411_s23, 0  ;;  %p1014_p4 = scmp.lt.s32.totalorder %s5411_s23, 1 }
  0xf0   : > { %s5417_s28 = sld [smem:[#allocation57_spill]]  ;;  %s4911_s3 = scalar_lea.vmem [#allocation20], %s5420_s26 }
  0xf1   : > { %s5462_s4 = smov (!%p1005_p1, %s5412_s4), 0  ;;  %s5419_s17 = sld [smem:[#allocation59_spill]] }
  0xf2   : > { %s4871_s13 = scalar_select %p1014_p4, %s5411_s23, 1 }
  0xf3   : > { %p1007_p3 = scmp.lt.s32.totalorder %s5462_s4, 3  ;;  %p3293_p7 = scmp.ne.s32.totalorder %s5411_s23, 0 }
  0xf4   : > { %s3666_s22 = smul.u32 3, %s4871_s13  ;;  %s3443_s24 = sshll.u32 %s4871_s13, 6 }
  0xf5   : > { %s5464_s4 = smov (!%p1007_p3, %s5462_s4), 3  ;;  %s4883_s15 = scalar_lea.vmem %s5414_s10, %s3443_s24 }
  0xf6   : > { %s4878_s5 = scalar_lea.vmem %s5413_s2, %s3666_s22  ;;  %s3442_s25 = sshll.u32 %s5464_s4, 3 }
  0xf7   : > { %s1025_s1 = scalar_lea.vmem %s5415_s29, %s4871_s13  ;;  %s1011_s7 = scalar_lea.vmem %s5416_s6, %s3442_s25 }
  0xf8   : > { %s3444_s11 = sshll.u32 %s4871_s13, 8  ;;  %s3290_s9 = sshll.u32 %s4871_s13, 2 }
  0xf9   : > { %s4896_s22 = scalar_lea.vmem %s5417_s28, %s3444_s11  ;;  %s5418_s24 = sld [smem:[#allocation58_spill]] }
  0xfa   : > { %s4907_s29 = scalar_lea.vmem %s5419_s17, %s3444_s11  ;;  %s5421_s16 = sld [smem:[#allocation45_spill]] (!%p3293_p7) }
  0xfb   : > { %1044 = sbr.rel (%p3293_p7) target bundleno = 795 (0x31b), region = 148  ;;  %s5422_s12 = sld [smem:[#allocation46_spill]] (!%p3293_p7) }
  0xfc   : > { %s5423_s0 = sld [smem:[#allocation33_spill]] (!%p3293_p7) }
  0xff   : > { %s4902_s27 = scalar_lea.vmem %s5418_s24, %s3290_s9  ;;  %s5424_s9 = sld [smem:[#allocation47_spill]] (!%p3293_p7) }
 0x100   : > { %v3846_v0 = vld [vmem:[%s5421_s16 + $0x78] sm:$0xff]   ;;  %v3848_v2 = vld [vmem:[%s5421_s16 + $0x70] sm:$0xff]   ;;  %v3850_v4 = vld [vmem:[%s5421_s16 + $0x68] sm:$0xff]  }
 0x101   : > { %v3847_v1 = vld [vmem:[%s5421_s16 + $0x38] sm:$0xff]   ;;  %3446 = vmatprep.subr.bf16.mxu0 %v3846_v0  ;;  %v3849_v3 = vld [vmem:[%s5421_s16 + $0x30] sm:$0xff]   ;;  %v3851_v5 = vld [vmem:[%s5421_s16 + $0x28] sm:$0xff]  }
 0x102   : > { %3447 = vmatpush3.bf16.msra.mxu0 %v3847_v1  ;;  %v3852_v6 = vld [vmem:[%s5421_s16 + $0x60] sm:$0xff]   ;;  %v3854_v8 = vld [vmem:[%s5421_s16 + $0x58] sm:$0xff]   ;;  %v3856_v10 = vld [vmem:[%s5421_s16 + $0x50] sm:$0xff]   ;;  %s3314_s11 = sshll.u32 %s5423_s0, 3 }
 0x103   : > { %3448 = vmatprep.subr.bf16.mxu0 %v3848_v2  ;;  %v3853_v7 = vld [vmem:[%s5421_s16 + $0x20] sm:$0xff]   ;;  %v3855_v9 = vld [vmem:[%s5421_s16 + $0x18] sm:$0xff]   ;;  %v3857_v13 = vld [vmem:[%s5421_s16 + $0x10] sm:$0xff]   ;;  %s1251_s21 = scalar_lea.vmem [#allocation2], %s3314_s11 }
 0x104   : > { %v1045_v11 = vld [vmem:[%s1011_s7] sm:$0xff]  ;;  %v3858_v14 = vld [vmem:[%s5421_s16 + $0x48] sm:$0xff]  }
 0x105   : > { %v3295_v12 = vcombine.high %v1045_v11, %v1045_v11  ;;  %v3859_v15 = vld [vmem:[%s5421_s16 + $0x8] sm:$0xff]   ;;  %v3860_v16 = vld [vmem:[%s5421_s16 + $0x40] sm:$0xff]   ;;  %v3294_v18 = vcombine.low %v1045_v11, %v1045_v11 }
 0x106   : > { %3449 = vmatpush3.bf16.msra.mxu0 %v3849_v3  ;;  %v3861_v17 = vld [vmem:[%s5421_s16] sm:$0xff]  }
 0x107   : > { %3450 = vmatprep.subr.bf16.mxu0 %v3850_v4  ;;  %1214 = vmatprep.mubr.bf16.mxu0 %v3295_v12  ;;  %v1078_v21 = vld [vmem:[%s5422_s12] sm:$0xff] }
 0x108   : > { %v3312_v34 = vld [vmem:[%s5424_s9] ss:$0 sm:$0xff] }
 0x109   : > { %v3313_v36 = vld [vmem:[#allocation3] ss:$0 sm:$0xff] }
 0x10a   : > { %3451 = vmatpush3.bf16.msra.mxu0 %v3851_v5 }
 0x10b   : > { %3452 = vmatprep.subr.bf16.mxu0 %v3852_v6 }
 0x10e   : > { %3453 = vmatpush3.bf16.msra.mxu0 %v3853_v7 }
 0x10f   : > { %3454 = vmatprep.subr.bf16.mxu0 %v3854_v8 }
 0x112   : > { %3455 = vmatpush3.bf16.msra.mxu0 %v3855_v9 }
 0x113   : > { %3456 = vmatprep.subr.bf16.mxu0 %v3856_v10 }
 0x116   : > { %3457 = vmatpush3.bf16.msra.mxu0 %v3857_v13 }
 0x117   : > { %3458 = vmatprep.subr.bf16.mxu0 %v3858_v14 }
 0x11a   : > { %3459 = vmatpush3.bf16.msra.mxu0 %v3859_v15 }
 0x11b   : > { %3460 = vmatprep.subr.bf16.mxu0 %v3860_v16 }
 0x11e   : > { %3461 = vmatpush3.bf16.msra.mxu0 %v3861_v17 }
 0x121   : > { %1215 = vmatmul.mubr.bf16.vlgmr.msra.gmra.mxu0 %v3294_v18 }
 0x1e1   : > { %v3462_v19 = vpop.f32.mrf.mxu0 }
 0x1e3   : > { %v3463_v20 = vpop.f32.mrf.mxu0 }
 0x1e4   : > { %v3464_v22 = vadd.f32 %v3463_v20, %v3462_v19 }
 0x1e5   : > { %v3465_v23 = vpop.f32.mrf.mxu0 }
 0x1e6   : > { %v1217_v24 = vadd.f32 %v3464_v22, %v1078_v21 }
 0x1e7   : > { %v3466_v25 = vpop.f32.mrf.mxu0 }
 0x1e8   : > { %1224 = vadd.xlane.f32.xlu0 %v1217_v24 }
 0x271   : > { %v1225_v26 = vpop.xlane.xlu0 %1224 }
 0x272   : > { %v1227_v27 = vmul.f32 0.0078125, %v1225_v26 }
 0x274   : > { %v1228_v28 = vsub.f32 %v1217_v24, %v1227_v27 }
 0x276   : > { %v1229_v29 = vmul.f32 %v1228_v28, %v1228_v28 }
 0x278   : > { %1230 = vadd.xlane.f32.xlu0 %v1229_v29 }
 0x301   : > { %v1231_v30 = vpop.xlane.xlu0 %1230 }
 0x302   : > { %v1232_v31 = vmul.f32 0.0078125, %v1231_v30 }
 0x304   : > { %v1233_v32 = vadd.f32 1e-05, %v1232_v31 }
 0x306   : > { %3864 = vrsqrt.f32 %v1233_v32 }
 0x313   : > { %v3865_v33 = vpop.eup %3864 }
 0x314   : > { %v1235_v35 = vmul.f32 %v3865_v33, %v1228_v28 }
 0x316   : > { %v1242_v37 = vmul.f32 %v3312_v34, %v1235_v35 }
 0x318   : > { %v1249_v38 = vadd.f32 %v3313_v36, %v1242_v37 }
 0x31a   : > { %1252 = vst [vmem:[%s1251_s21] sm:$0xff] %v1249_v38 }
 0x31b PF: > { %s5425_s23 = sld [smem:[#allocation33_spill]]  ;;  %v3866_v40 = vld [vmem:[%s4845_s8 + $0xac] ss:$12 sps:$4 sm:$0xff]   ;;  %v3868_v41 = vld [vmem:[%s4845_s8 + $0xa8] ss:$12 sps:$4 sm:$0xff]   ;;  %v4458_v42 = vmov 0.0   ;;  %v1319_v16 = vlaneseq }
 0x31c   : > { %3555 = vmatprep.subr.bf16.mxu1 %v4458_v42  ;;  %v3869_v43 = vld [vmem:[%s4845_s8 + $0xb0] ss:$12 sps:$4 sm:$0xff]   ;;  %v3870_v44 = vld [vmem:[%s4845_s8 + $0x94] ss:$12 sps:$4 sm:$0xff]   ;;  %1462 = vmatprep.subr.bf16.mxu0 %v3866_v40  ;;  %v3873_v46 = vld [vmem:[%s4845_s8 + $0x98] ss:$12 sps:$4 sm:$0xff]  }
 0x31d   : > { %v3872_v45 = vld [vmem:[%s4845_s8 + $0x90] ss:$12 sps:$4 sm:$0xff]   ;;  %1463 = vmatpush1.bf16.msra.mxu0 %v3868_v41  ;;  %3556 = vmatpush3.bf16.msra.mxu1 %v3869_v43  ;;  %v3876_v52 = vld [vmem:[%s4845_s8 + $0x78] ss:$12 sps:$4 sm:$0xff]   ;;  %v3877_v53 = vld [vmem:[%s4845_s8 + $0x80] ss:$12 sps:$4 sm:$0xff]  }
 0x31e   : > { %1464 = vmatprep.subr.bf16.mxu0 %v3870_v44  ;;  %3557 = vmatprep.subr.bf16.mxu1 %v4458_v42  ;;  %v3874_v51 = vld [vmem:[%s4845_s8 + $0x7c] ss:$12 sps:$4 sm:$0xff]   ;;  %v3878_v54 = vld [vmem:[%s4845_s8 + $0x64] ss:$12 sps:$4 sm:$0xff]   ;;  %v3880_v55 = vld [vmem:[%s4845_s8 + $0x60] ss:$12 sps:$4 sm:$0xff]  }
 0x31f   : > { %v3881_v56 = vld [vmem:[%s4845_s8 + $0x68] ss:$12 sps:$4 sm:$0xff]   ;;  %v3882_v57 = vld [vmem:[%s4845_s8 + $0x4c] ss:$12 sps:$4 sm:$0xff]   ;;  %v3885_v59 = vld [vmem:[%s4845_s8 + $0x50] ss:$12 sps:$4 sm:$0xff]  }
 0x320   : > { %v3884_v58 = vld [vmem:[%s4845_s8 + $0x48] ss:$12 sps:$4 sm:$0xff]   ;;  %v4459_v61 = vmov 0   ;;  %vm4460_vm0 = vmmov 0   ;;  %v3888_v62 = vld [vmem:[%s4845_s8 + $0x30] ss:$12 sps:$4 sm:$0xff]  }
 0x321   : > { %s3315_s2 = sshll.u32 %s5425_s23, 3  ;;  %1465 = vmatpush1.bf16.msra.mxu0 %v3872_v45  ;;  %3558 = vmatpush3.bf16.msra.mxu1 %v3873_v46  ;;  %v3886_v60 = vld [vmem:[%s4845_s8 + $0x34] ss:$12 sps:$4 sm:$0xff]   ;;  %v3889_v63 = vld [vmem:[%s4845_s8 + $0x38] ss:$12 sps:$4 sm:$0xff]   ;;  %s5426_s24 = scalar_lea.vmem [#allocation6], %s4836_s19 }
 0x322   : > { %s4970_s14 = scalar_lea.vmem [#allocation2], %s3315_s2  ;;  %3559 = vmatprep.subr.bf16.mxu1 %v4458_v42  ;;  %1466 = vmatprep.subr.bf16.mxu0 %v3874_v51  ;;  %v3890_v0 = vld [vmem:[%s4845_s8 + $0x1c] ss:$12 sps:$4 sm:$0xff]   ;;  %v3892_v1 = vld [vmem:[%s4845_s8 + $0x18] ss:$12 sps:$4 sm:$0xff]   ;;  %s5427_s4 = scalar_lea.vmem [#allocation8], %s4836_s19 }
 0x323   : > { %v4973_v39 = vld [vmem:[%s4970_s14] sm:$0xff]  ;;  %1494 = vmatprep.mubr.bf16.mxu0 %v4459_v61  ;;  %3571 = vmatprep.mubr.msk.bf16.mxu1 %vm4460_vm0, %v4458_v42  ;;  %v3894_v3 = vld [vmem:[%s4845_s8 + $0x4] ss:$12 sps:$4 sm:$0xff]   ;;  %v3897_v5 = vld [vmem:[%s4845_s8 + $0x8] ss:$12 sps:$4 sm:$0xff]   ;;  %v5022_v17 = vshrl.u32 %v1319_v16, 7 }
 0x324   : > { %1258 = vadd.xlane.f32.xlu0 %v4973_v39  ;;  %v3893_v2 = vld [vmem:[%s4845_s8 + $0x20] ss:$12 sps:$4 sm:$0xff]   ;;  %v3316_v10 = vld [vmem:[%s5426_s24] ss:$0 sm:$0xff]  ;;  %vm1551_vm1 = vcmask 261120   ;;  %vm1614_vm2 = vcmask 1043456  }
 0x325   : > { %1467 = vmatpush1.bf16.msra.mxu0 %v3876_v52  ;;  %3560 = vmatpush3.bf16.msra.mxu1 %v3877_v53  ;;  %v3896_v4 = vld [vmem:[%s4845_s8] ss:$12 sps:$4 sm:$0xff]   ;;  %v3317_v12 = vld [vmem:[%s5427_s4] ss:$0 sm:$0xff]  ;;  %v1325_v18 = vsub.s32 1, %v5022_v17  ;;  %v1321_v19 = vsub.s32 0, %v5022_v17 }
 0x326   : > { %3561 = vmatprep.subr.bf16.mxu1 %v4458_v42  ;;  %1468 = vmatprep.subr.bf16.mxu0 %v3878_v54  ;;  %v1317_v20 = vld [vmem:[%s4878_s5] sm:$0x7]  ;;  %v1329_v21 = vsub.s32 2, %v5022_v17  ;;  %s4461_s8 = smov 96   ;;  %s4462_s5 = smov 32   ;;  %v1545_v44 = vand.u32 127, %v1319_v16 }
 0x327   : > { %v1326_v22 = vrot.slane %v1317_v20, %v1325_v18  ;;  %v1322_v25 = vrot.slane %v1317_v20, %v1321_v19  ;;  %v4463_v45 = vmov -1e+30   ;;  %vm1598_vm4 = vcmask 64512   ;;  %s4464_s7 = smov 64   ;;  %s5430_s13 = scalar_lea.vmem [#allocation12], %s4836_s19 }
 0x328   : > { %v1330_v28 = vrot.slane %v1317_v20, %v1329_v21  ;;  %vm1546_vm3 = vcmp.lt.s32.totalorder %v1545_v44, 5  ;;  %vm2004_vm5 = vcmask 523264   ;;  %vm2006_vm6 = vcmask 785408  }
 0x329   : > { %1469 = vmatpush1.bf16.msra.mxu0 %v3880_v55  ;;  %3562 = vmatpush3.bf16.msra.mxu1 %v3881_v56  ;;  %v5046_v46 = vsel %vm1546_vm3, 0.0, %v4463_v45 }
 0x32a   : > { %1470 = vmatprep.subr.bf16.mxu0 %v3882_v57  ;;  %3563 = vmatprep.subr.bf16.mxu1 %v4458_v42 }
 0x32d   : > { %1471 = vmatpush1.bf16.msra.mxu0 %v3884_v58  ;;  %3564 = vmatpush3.bf16.msra.mxu1 %v3885_v59 }
 0x32e   : > { %1472 = vmatprep.subr.bf16.mxu0 %v3886_v60  ;;  %3565 = vmatprep.subr.bf16.mxu1 %v4458_v42 }
 0x331   : > { %1473 = vmatpush1.bf16.msra.mxu0 %v3888_v62  ;;  %3566 = vmatpush3.bf16.msra.mxu1 %v3889_v63 }
 0x332   : > { %1474 = vmatprep.subr.bf16.mxu0 %v3890_v0  ;;  %3567 = vmatprep.subr.bf16.mxu1 %v4458_v42 }
 0x335   : > { %1475 = vmatpush1.bf16.msra.mxu0 %v3892_v1  ;;  %3568 = vmatpush3.bf16.msra.mxu1 %v3893_v2 }
 0x336   : > { %1476 = vmatprep.subr.bf16.mxu0 %v3894_v3  ;;  %3569 = vmatprep.subr.bf16.mxu1 %v4458_v42 }
 0x339   : > { %1477 = vmatpush1.bf16.msra.mxu0 %v3896_v4  ;;  %3570 = vmatpush3.bf16.msra.mxu1 %v3897_v5 }
 0x33a   : > { %3575 = vmatprep.subr.bf16.mxu1 %v4458_v42  ;;  %3599 = vmatprep.subr.bf16.mxu0 %v4458_v42 }
 0x3ad   : > { %v1259_v47 = vpop.xlane.xlu0 %1258 }
 0x3ae   : > { %v1261_v48 = vmul.f32 0.0078125, %v1259_v47 }
 0x3b0   : > { %v1262_v49 = vsub.f32 %v4973_v39, %v1261_v48 }
 0x3b2   : > { %v1263_v50 = vmul.f32 %v1262_v49, %v1262_v49 }
 0x3b4   : > { %1264 = vadd.xlane.f32.xlu0 %v1263_v50 }
 0x43d   : > { %v1265_v6 = vpop.xlane.xlu0 %1264 }
 0x43e   : > { %v1266_v7 = vmul.f32 0.0078125, %v1265_v6 }
 0x440   : > { %v1267_v8 = vadd.f32 1e-05, %v1266_v7 }
 0x442   : > { %3986 = vrsqrt.f32 %v1267_v8 }
 0x44f   : > { %v3987_v9 = vpop.eup %3986 }
 0x450   : > { %v1269_v11 = vmul.f32 %v3987_v9, %v1262_v49 }
 0x452   : > { %v1276_v13 = vmul.f32 %v3316_v10, %v1269_v11 }
 0x454   : > { %v1283_v14 = vadd.f32 %v3317_v12, %v1276_v13 }
 0x456   : > { %v1316_v15 = vpack.c.bf16 %v1283_v14, %v1283_v14 }
 0x458   : > { %1495 = vmatmul.mubr.bf16.vlgmr.msra.gmra.mxu0 %v1316_v15  ;;  %3572 = vmatmul.mubr.bf16.vlgmr.msra.gmra.mxu1 %v1316_v15 }
 0x459   : > { %3577 = vmatprep.mubr.msk.bf16.mxu1 %vm4460_vm0, %v4458_v42  ;;  %3601 = vmatprep.mubr.msk.bf16.mxu0 %vm4460_vm0, %v4458_v42 }
 0x518   : > { %v1496_v23 = vpop.f32.mrf.mxu0  ;;  %v1537_v24 = vpop.f32.mrf.mxu1 }
 0x519   : > { %v1497_v32 = vadd.f32 %v1496_v23, %v1322_v25  ;;  %v1538_v36 = vadd.f32 %v1537_v24, %v1330_v28 }
 0x51a   : > { %v1498_v26 = vpop.f32.mrf.mxu0  ;;  %v3573_v27 = vpop.f32.mrf.mxu1 }
 0x51b   : > { %v1499_v29 = vadd.f32 %v1498_v26, %v1326_v22  ;;  %v1543_v38 = vmul.f32 0.17677669, %v1497_v32  ;;  %v5037_v40 = vpack.c.bf16 %v1538_v36, %v1538_v36 }
 0x51c   : > { %v1500_v30 = vpop.f32.mrf.mxu0  ;;  %v1540_v31 = vpop.f32.mrf.mxu1 }
 0x51d   : > { %v1549_v33 = vpack.c.bf16 %v1499_v29, %v1499_v29  ;;  %v1548_v41 = vpack.c.bf16 %v1543_v38, %v1543_v38  ;;  %v1616_v43 = vsel %vm1614_vm2, %v5037_v40, 0 }
 0x51e   : > { %v1501_v34 = vpop.f32.mrf.mxu0  ;;  %v3574_v35 = vpop.f32.mrf.mxu1 }
 0x51f   : > { %1662 = vrot.lane.b32.xlu0 %v1549_v33, %s4461_s8  ;;  %v1556_v37 = vsel %vm1551_vm1, %v1549_v33, 0 }
 0x520   : > { %3576 = vmatpush3.bf16.xpose.msra.mxu1 %v1556_v37 }
 0x521   : > { %3581 = vmatprep.subr.bf16.mxu1 %v4458_v42 }
 0x523   : > { %1883 = vrot.lane.b32.xlu0 %v1549_v33, %s4462_s5 }
 0x527   : > { %3578 = vmatmul.mubr.msk.bf16.vlgmr.msra.gmra.mxu1 %vm1551_vm1, %v1548_v41 }
 0x528   : > { %3582 = vmatpush3.bf16.msra.mxu1 %v1616_v43  ;;  %3583 = vmatprep.mubr.msk.bf16.mxu1 %vm4460_vm0, %v4458_v42 }
 0x529   : > { %3587 = vmatprep.subr.bf16.mxu1 %v4458_v42 }
 0x591   : > { %v1663_v60 = vpop.permute.xlu0 %1662 }
 0x592   : > { %v1668_v6 = vsel %vm1551_vm1, %v1663_v60, 0 }
 0x595   : > { %v1884_v1 = vpop.permute.xlu0 %1883 }
 0x596   : > { %v1889_v4 = vsel %vm1551_vm1, %v1884_v1, 0 }
 0x5e7   : > { %v1592_v47 = vpop.f32.mrf.mxu1 }
 0x5e8   : > { %v1593_v48 = vadd.f32 %v1592_v47, %v5046_v46 }
 0x5e9   : > { %v3579_v49 = vpop.f32.mrf.mxu1 }
 0x5ea   : > { %v1599_v50 = vsel %vm1598_vm4, %v1593_v48, -inf }
 0x5eb   : > { %1600 = vmax.xlane.f32.xlu1 %v1599_v50  ;;  %v1595_v51 = vpop.f32.mrf.mxu1 }
 0x5ed   : > { %v3580_v52 = vpop.f32.mrf.mxu1 }
 0x674   : > { %v1601_v53 = vpop.xlane.xlu1 %1600 }
 0x675   : > { %v1602_v54 = vsub.f32 %v1593_v48, %v1601_v53 }
 0x677   : > { %v1603_v55 = vmul.f32 1.442695, %v1602_v54 }
 0x679   : > { %3988 = vpow2.f32 %v1603_v55 }
 0x686   : > { %v3989_v56 = vpop.eup %3988 }
 0x687   : > { %v1605_v57 = vsel %vm1598_vm4, %v3989_v56, 0.0 }
 0x688   : > { %1606 = vadd.xlane.f32.xlu1 %v1605_v57 }
 0x699   : > { %1659 = vrot.lane.b32.xlu1 %v1548_v41, %s4461_s8 }
 0x69d   : > { %1773 = vrot.lane.b32.xlu1 %v1549_v33, %s4464_s7 }
 0x6a1   : > { %1771 = vrot.lane.b32.xlu1 %v1548_v41, %s4464_s7 }
 0x6a5   : > { %1881 = vrot.lane.b32.xlu1 %v1548_v41, %s4462_s5 }
 0x711   : > { %v1607_v58 = vpop.xlane.xlu1 %1606 }
 0x712   : > { %3990 = vrcp.f32 %v1607_v58 }
 0x715   : > { %v1660_v59 = vpop.permute.xlu1 %1659 }
 0x719   : > { %v1774_v62 = vpop.permute.xlu1 %1773 }
 0x71a   : > { %v1779_v63 = vsel %vm1551_vm1, %v1774_v62, 0 }
 0x71b   : > { %3600 = vmatpush3.bf16.xpose.msra.mxu0 %v1779_v63 }
 0x71c   : > { %3611 = vmatprep.subr.bf16.mxu0 %v4458_v42 }
 0x71d   : > { %v1772_v3 = vpop.permute.xlu1 %1771 }
 0x71f   : > { %v3991_v0 = vpop.eup %3990 }
 0x720   : > { %v1609_v2 = vmul.f32 %v3991_v0, %v3989_v56 }
 0x721   : > { %v1882_v7 = vpop.permute.xlu1 %1881 }
 0x722   : > { %3602 = vmatmul.mubr.msk.bf16.vlgmr.msra.gmra.mxu0 %vm1551_vm1, %v1772_v3  ;;  %v1610_v5 = vpack.c.bf16 %v1609_v2, %v1609_v2 }
 0x723   : > { %3612 = vmatpush3.bf16.xpose.msra.mxu0 %v1889_v4  ;;  %3613 = vmatprep.mubr.msk.bf16.mxu0 %vm4460_vm0, %v4458_v42 }
 0x724   : > { %3584 = vmatmul.mubr.msk.bf16.vlgmr.msra.gmra.mxu1 %vm1598_vm4, %v1610_v5  ;;  %3623 = vmatprep.subr.bf16.mxu0 %v4458_v42 }
 0x725   : > { %3588 = vmatpush3.bf16.xpose.msra.mxu1 %v1668_v6  ;;  %3589 = vmatprep.mubr.msk.bf16.mxu1 %vm4460_vm0, %v4458_v42  ;;  %v3898_v6 = vld [vmem:[%s4883_s15 + $0x38] sm:$0xff]  }
 0x726   : > { %3593 = vmatprep.subr.bf16.mxu1 %v4458_v42 }
 0x72a   : > { %3614 = vmatmul.mubr.msk.bf16.vlgmr.msra.gmra.mxu0 %vm1551_vm1, %v1882_v7  ;;  %v3899_v7 = vld [vmem:[%s4883_s15 + $0x30] sm:$0xff]  }
 0x72b   : > { %3639 = vmatprep.mubr.msk.bf16.mxu0 %vm4460_vm0, %v4458_v42  ;;  %3624 = vmatpush3.bf16.msra.mxu0 %v3898_v6  ;;  %v3936_v6 = vld [vmem:[%s4896_s22 + $0x40] ss:$16 sps:$4 sm:$0xff]  }
 0x72c   : > { %3590 = vmatmul.mubr.msk.bf16.vlgmr.msra.gmra.mxu1 %vm1551_vm1, %v1660_v59  ;;  %3625 = vmatprep.subr.bf16.mxu0 %v4458_v42 }
 0x72d   : > { %3595 = vmatprep.mubr.msk.bf16.mxu1 %vm4460_vm0, %v4458_v42 }
 0x72f   : > { %3626 = vmatpush3.bf16.msra.mxu0 %v3899_v7  ;;  %v3939_v7 = vld [vmem:[%s4896_s22 + $0x48] ss:$16 sps:$4 sm:$0xff]  }
 0x730   : > { %3627 = vmatprep.subr.bf16.mxu0 %v4458_v42 }
 0x7e2   : > { %v1815_v8 = vpop.f32.mrf.mxu0 }
 0x7e3   : > { %v1816_v9 = vadd.f32 %v1815_v8, %v5046_v46  ;;  %v3900_v8 = vld [vmem:[%s4883_s15 + $0x28] sm:$0xff]  }
 0x7e4   : > { %v5074_v10 = vpop.f32.mrf.mxu1  ;;  %v3603_v11 = vpop.f32.mrf.mxu0  ;;  %3628 = vmatpush3.bf16.msra.mxu0 %v3900_v8  ;;  %v3944_v8 = vld [vmem:[%s4896_s22 + $0x24] ss:$16 sps:$4 sm:$0xff]  }
 0x7e5   : > { %v1821_v12 = vsel %vm1598_vm4, %v1816_v9, -inf  ;;  %3629 = vmatprep.subr.bf16.mxu0 %v4458_v42  ;;  %v3902_v11 = vld [vmem:[%s4883_s15 + $0x18] sm:$0xff]  }
 0x7e6   : > { %1822 = vmax.xlane.f32.xlu1 %v1821_v12  ;;  %v3585_v13 = vpop.f32.mrf.mxu1  ;;  %v1818_v14 = vpop.f32.mrf.mxu0  ;;  %v3903_v12 = vld [vmem:[%s4883_s15 + $0x10] sm:$0xff]  }
 0x7e7   : > { %v3904_v13 = vld [vmem:[%s4883_s15 + $0x8] sm:$0xff]  }
 0x7e8   : > { %v1655_v15 = vpop.f32.mrf.mxu1  ;;  %v3604_v16 = vpop.f32.mrf.mxu0 }
 0x7e9   : > { %v3905_v16 = vld [vmem:[%s4883_s15] sm:$0xff]  }
 0x7ea   : > { %v3586_v20 = vpop.f32.mrf.mxu1  ;;  %v1925_v22 = vpop.f32.mrf.mxu0 }
 0x7eb   : > { %v1926_v28 = vadd.f32 %v1925_v22, %v5046_v46 }
 0x7ec   : > { %v1704_v23 = vpop.f32.mrf.mxu1  ;;  %v3615_v24 = vpop.f32.mrf.mxu0 }
 0x7ed   : > { %v1705_v25 = vadd.f32 %v1704_v23, %v5046_v46  ;;  %v1931_v33 = vsel %vm1598_vm4, %v1926_v28, -inf }
 0x7ee   : > { %v3591_v26 = vpop.f32.mrf.mxu1  ;;  %v1928_v27 = vpop.f32.mrf.mxu0 }
 0x7ef   : > { %v1710_v29 = vsel %vm1598_vm4, %v1705_v25, -inf }
 0x7f0   : > { %v3616_v30 = vpop.f32.mrf.mxu0  ;;  %1711 = vmax.xlane.f32.xlu0 %v1710_v29  ;;  %v1707_v31 = vpop.f32.mrf.mxu1 }
 0x7f2   : > { %v3592_v32 = vpop.f32.mrf.mxu1 }
 0x7f4   : > { %1932 = vmax.xlane.f32.xlu0 %v1931_v33 }
 0x86f   : > { %v1823_v34 = vpop.xlane.xlu1 %1822 }
 0x870   : > { %v1824_v35 = vsub.f32 %v1816_v9, %v1823_v34  ;;  %v3901_v9 = vld [vmem:[%s4883_s15 + $0x20] sm:$0xff]  }
 0x871   : > { %3630 = vmatpush3.bf16.msra.mxu0 %v3901_v9  ;;  %v3947_v9 = vld [vmem:[%s4896_s22 + $0x2c] ss:$16 sps:$4 sm:$0xff]  }
 0x872   : > { %v1825_v36 = vmul.f32 1.442695, %v1824_v35  ;;  %3631 = vmatprep.subr.bf16.mxu0 %v4458_v42 }
 0x874   : > { %3992 = vpow2.f32 %v1825_v36 }
 0x875   : > { %3632 = vmatpush3.bf16.msra.mxu0 %v3902_v11  ;;  %v3942_v11 = vld [vmem:[%s4896_s22 + $0x20] ss:$16 sps:$4 sm:$0xff]  }
 0x876   : > { %3633 = vmatprep.subr.bf16.mxu0 %v4458_v42 }
 0x879   : > { %v1712_v37 = vpop.xlane.xlu0 %1711  ;;  %3634 = vmatpush3.bf16.msra.mxu0 %v3903_v12  ;;  %v3945_v12 = vld [vmem:[%s4896_s22 + $0x28] ss:$16 sps:$4 sm:$0xff]  }
 0x87a   : > { %v1713_v38 = vsub.f32 %v1705_v25, %v1712_v37  ;;  %3635 = vmatprep.subr.bf16.mxu0 %v4458_v42 }
 0x87c   : > { %v1714_v41 = vmul.f32 1.442695, %v1713_v38  ;;  %v3358_v38 = vld [vmem:[%s1025_s1] ss:$0 sm:$0xff]  ;;  %s5429_s1 = scalar_lea.vmem [#allocation11], %s4836_s19 }
 0x87d   : > { %v1933_v43 = vpop.xlane.xlu0 %1932  ;;  %3636 = vmatpush3.bf16.msra.mxu0 %v3904_v13  ;;  %v3950_v13 = vld [vmem:[%s4896_s22 + $0x4] ss:$16 sps:$4 sm:$0xff]  }
 0x87e   : > { %3994 = vpow2.f32 %v1714_v41  ;;  %v1934_v44 = vsub.f32 %v1926_v28, %v1933_v43  ;;  %3637 = vmatprep.subr.bf16.mxu0 %v4458_v42 }
 0x880   : > { %v1935_v45 = vmul.f32 1.442695, %v1934_v44 }
 0x881   : > { %v3993_v46 = vpop.eup %3992  ;;  %3638 = vmatpush3.bf16.msra.mxu0 %v3905_v16  ;;  %v3951_v16 = vld [vmem:[%s4896_s22 + $0x8] ss:$16 sps:$4 sm:$0xff]  }
 0x882   : > { %3996 = vpow2.f32 %v1935_v45  ;;  %v1827_v47 = vsel %vm1598_vm4, %v3993_v46, 0.0 }
 0x883   : > { %1828 = vadd.xlane.f32.xlu0 %v1827_v47  ;;  %v3908_v47 = vld [vmem:[%s4896_s22 + $0xe4] ss:$16 sps:$4 sm:$0xff]  }
 0x88b   : > { %v3995_v48 = vpop.eup %3994 }
 0x88c   : > { %v1716_v49 = vsel %vm1598_vm4, %v3995_v48, 0.0 }
 0x88d   : > { %1717 = vadd.xlane.f32.xlu0 %v1716_v49  ;;  %v3914_v49 = vld [vmem:[%s4896_s22 + $0xc4] ss:$16 sps:$4 sm:$0xff]  }
 0x88f   : > { %v3997_v50 = vpop.eup %3996 }
 0x890   : > { %v1937_v51 = vsel %vm1598_vm4, %v3997_v50, 0.0 }
 0x891   : > { %1938 = vadd.xlane.f32.xlu1 %v1937_v51  ;;  %v3915_v51 = vld [vmem:[%s4896_s22 + $0xc8] ss:$16 sps:$4 sm:$0xff]  }
 0x8a2   : > { %1833 = vrot.lane.b32.xlu1 %v5037_v40, %s4464_s7 }
 0x8a3   : > { %1723 = vrot.lane.b32.xlu0 %v5037_v40, %s4461_s8 }
 0x8a6   : > { %1943 = vrot.lane.b32.xlu1 %v5037_v40, %s4462_s5 }
 0x90c   : > { %v1829_v52 = vpop.xlane.xlu0 %1828 }
 0x916   : > { %v1718_v53 = vpop.xlane.xlu0 %1717 }
 0x917   : > { %3998 = vrcp.f32 %v1718_v53 }
 0x918   : > { %4000 = vrcp.f32 %v1829_v52 }
 0x91a   : > { %v1724_v54 = vpop.permute.xlu0 %1723  ;;  %v1939_v56 = vpop.xlane.xlu1 %1938 }
 0x91b   : > { %v1729_v55 = vsel %vm1614_vm2, %v1724_v54, 0  ;;  %4002 = vrcp.f32 %v1939_v56  ;;  %v3920_v56 = vld [vmem:[%s4896_s22 + $0xa4] ss:$16 sps:$4 sm:$0xff]  }
 0x91c   : > { %3594 = vmatpush3.bf16.msra.mxu1 %v1729_v55 }
 0x91d   : > { %3605 = vmatprep.subr.bf16.mxu1 %v4458_v42 }
 0x91e   : > { %v1834_v59 = vpop.permute.xlu1 %1833 }
 0x91f   : > { %v1839_v63 = vsel %vm1614_vm2, %v1834_v59, 0  ;;  %v3921_v59 = vld [vmem:[%s4896_s22 + $0xa8] ss:$16 sps:$4 sm:$0xff]  }
 0x922   : > { %v1944_v0 = vpop.permute.xlu1 %1943 }
 0x923   : > { %v1949_v3 = vsel %vm1614_vm2, %v1944_v0, 0  ;;  %v3932_v0 = vld [vmem:[%s4896_s22 + $0x64] ss:$16 sps:$4 sm:$0xff]  }
 0x924   : > { %v3999_v57 = vpop.eup %3998 }
 0x925   : > { %v1720_v58 = vmul.f32 %v3999_v57, %v3995_v48  ;;  %v4001_v62 = vpop.eup %4000  ;;  %v3911_v48 = vld [vmem:[%s4896_s22 + $0xec] ss:$16 sps:$4 sm:$0xff]  }
 0x926   : > { %v1831_v40 = vmul.f32 %v4001_v62, %v3993_v46  ;;  %v3906_v46 = vld [vmem:[%s4896_s22 + $0xe0] ss:$16 sps:$4 sm:$0xff]   ;;  %2405 = vmatprep.subr.bf16.mxu0 %v3911_v48  ;;  %v3923_v57 = vld [vmem:[%s4896_s22 + $0xac] ss:$16 sps:$4 sm:$0xff]   ;;  %v3926_v62 = vld [vmem:[%s4896_s22 + $0x84] ss:$16 sps:$4 sm:$0xff]  }
 0x927   : > { %v1721_v60 = vpack.c.bf16 %v1720_v58, %v1720_v58  ;;  %v3918_v58 = vld [vmem:[%s4896_s22 + $0xa0] ss:$16 sps:$4 sm:$0xff]   ;;  %v3970_v48 = vld [vmem:[%s4907_s29 + $0x58] sm:$0xff]  }
 0x928   : > { %v1832_v1 = vpack.c.bf16 %v1831_v40, %v1831_v40  ;;  %v4003_v2 = vpop.eup %4002  ;;  %v3929_v40 = vld [vmem:[%s4896_s22 + $0x8c] ss:$16 sps:$4 sm:$0xff]  }
 0x929   : > { %3596 = vmatmul.mubr.msk.bf16.vlgmr.msra.gmra.mxu1 %vm1598_vm4, %v1721_v60  ;;  %v1941_v4 = vmul.f32 %v4003_v2, %v3997_v50  ;;  %v3917_v50 = vld [vmem:[%s4896_s22 + $0xcc] ss:$16 sps:$4 sm:$0xff]   ;;  %v3924_v60 = vld [vmem:[%s4896_s22 + $0x80] ss:$16 sps:$4 sm:$0xff]  }
 0x92a   : > { %3606 = vmatpush3.bf16.msra.mxu1 %v1839_v63  ;;  %3607 = vmatprep.mubr.msk.bf16.mxu1 %vm4460_vm0, %v4458_v42  ;;  %v3927_v63 = vld [vmem:[%s4896_s22 + $0x88] ss:$16 sps:$4 sm:$0xff]   ;;  %v3930_v2 = vld [vmem:[%s4896_s22 + $0x60] ss:$16 sps:$4 sm:$0xff]  }
 0x92b   : > { %3617 = vmatprep.subr.bf16.mxu1 %v4458_v42  ;;  %v1942_v5 = vpack.c.bf16 %v1941_v4, %v1941_v4  ;;  %v3938_v4 = vld [vmem:[%s4896_s22 + $0x44] ss:$16 sps:$4 sm:$0xff]  }
 0x931   : > { %3608 = vmatmul.mubr.msk.bf16.vlgmr.msra.gmra.mxu1 %vm1598_vm4, %v1832_v1  ;;  %v3935_v1 = vld [vmem:[%s4896_s22 + $0x6c] ss:$16 sps:$4 sm:$0xff]  }
 0x932   : > { %3618 = vmatpush3.bf16.msra.mxu1 %v1949_v3  ;;  %3619 = vmatprep.mubr.msk.bf16.mxu1 %vm4460_vm0, %v4458_v42  ;;  %v3933_v3 = vld [vmem:[%s4896_s22 + $0x68] ss:$16 sps:$4 sm:$0xff]  }
 0x933   : > { %2364 = vmatprep.subr.bf16.mxu1 %v3908_v47  ;;  %v3968_v47 = vld [vmem:[%s4907_s29 + $0x20] sm:$0xff]  }
 0x939   : > { %3620 = vmatmul.mubr.msk.bf16.vlgmr.msra.gmra.mxu1 %vm1598_vm4, %v1942_v5  ;;  %v3941_v5 = vld [vmem:[%s4896_s22 + $0x4c] ss:$16 sps:$4 sm:$0xff]  }
 0x93a   : > { %2396 = vmatprep.mubr.bf16.mxu1 %v4459_v61  ;;  %2365 = vmatpush1.bf16.msra.mxu1 %v3906_v46  ;;  %v3967_v46 = vld [vmem:[%s4907_s29 + $0xe0] sm:$0xff]  }
 0x93b   : > { %2366 = vmatprep.subr.bf16.mxu1 %v3914_v49  ;;  %v3971_v49 = vld [vmem:[%s4907_s29 + $0xd8] sm:$0xff]  }
 0x9e9   : > { %v1765_v14 = vpop.f32.mrf.mxu1 }
 0x9ea   : > { %1992 = vrot.lane.b32.xlu1 %v1765_v14, %s4462_s5  ;;  %v3953_v14 = vld [vmem:[%s4896_s22 + $0xc] ss:$16 sps:$4 sm:$0xff]  }
 0x9eb   : > { %v3597_v15 = vpop.f32.mrf.mxu1 }
 0x9ec   : > { %v3948_v15 = vld [vmem:[%s4896_s22] ss:$16 sps:$4 sm:$0xff]  }
 0x9ed   : > { %v1768_v20 = vpop.f32.mrf.mxu1 }
 0x9ef   : > { %v3598_v22 = vpop.f32.mrf.mxu1 }
 0x9f1   : > { %v1875_v23 = vpop.f32.mrf.mxu1 }
 0x9f2   : > { %1996 = vrot.lane.b32.xlu0 %v1875_v23, %s4464_s7 }
 0x9f3   : > { %v3609_v24 = vpop.f32.mrf.mxu1 }
 0x9f5   : > { %v1878_v25 = vpop.f32.mrf.mxu1 }
 0x9f6   : > { %v3359_v25 = vld [vmem:[%s5429_s1] ss:$0 sm:$0xff] }
 0x9f7   : > { %v3610_v26 = vpop.f32.mrf.mxu1 }
 0x9f9   : > { %v1985_v27 = vpop.f32.mrf.mxu1 }
 0x9fa   : > { %2000 = vrot.lane.b32.xlu1 %v1985_v27, %s4461_s8  ;;  %v3360_v27 = vld [vmem:[%s5430_s13] ss:$0 sm:$0xff] }
 0x9fb   : > { %v3621_v28 = vpop.f32.mrf.mxu1 }
 0x9fd   : > { %v1988_v29 = vpop.f32.mrf.mxu1 }
 0x9ff   : > { %v3622_v30 = vpop.f32.mrf.mxu1 }
 0xa5c   : > { %v1993_v31 = vpop.permute.xlu1 %1992 }
 0xa5d   : > { %v2003_v32 = vsel %vm1551_vm1, %v5074_v10, %v1993_v31  ;;  %v3954_v31 = vld [vmem:[%s4907_s29 + $0x78] sm:$0xff]  }
 0xa64   : > { %v1997_v42 = vpop.permute.xlu0 %1996 }
 0xa65   : > { %v2005_v33 = vsel %vm2004_vm5, %v2003_v32, %v1997_v42  ;;  %v3955_v42 = vld [vmem:[%s4907_s29 + $0xf8] sm:$0xff]  }
 0xa66   : > { %v3956_v32 = vld [vmem:[%s4907_s29 + $0x38] sm:$0xff]  }
 0xa6c   : > { %v2001_v34 = vpop.permute.xlu1 %2000 }
 0xa6d   : > { %v2007_v35 = vsel %vm2006_vm6, %v2005_v33, %v2001_v34  ;;  %v3957_v33 = vld [vmem:[%s4907_s29 + $0xb8] sm:$0xff]   ;;  %v3958_v34 = vld [vmem:[%s4907_s29 + $0x70] sm:$0xff]  }
 0xa6e   : > { %v2024_v36 = vpack.c.bf16 %v2007_v35, %v2007_v35  ;;  %v3959_v35 = vld [vmem:[%s4907_s29 + $0xf0] sm:$0xff]  }
 0xa70   : > { %3640 = vmatmul.mubr.bf16.vlgmr.msra.gmra.mxu0 %v2024_v36  ;;  %v3960_v36 = vld [vmem:[%s4907_s29 + $0x30] sm:$0xff]  }
 0xa71   : > { %2437 = vmatprep.mubr.bf16.mxu0 %v4459_v61  ;;  %v3909_v61 = vld [vmem:[%s4896_s22 + $0xe8] ss:$16 sps:$4 sm:$0xff]  }
 0xa72   : > { %2406 = vmatpush1.bf16.msra.mxu0 %v3909_v61  ;;  %v3969_v61 = vld [vmem:[%s4907_s29 + $0xa0] sm:$0xff]  }
 0xa73   : > { %2407 = vmatprep.subr.bf16.mxu0 %v3917_v50  ;;  %v3972_v50 = vld [vmem:[%s4907_s29 + $0x18] sm:$0xff]  }
 0xa76   : > { %2408 = vmatpush1.bf16.msra.mxu0 %v3915_v51  ;;  %v3974_v51 = vld [vmem:[%s4907_s29 + $0x50] sm:$0xff]  }
 0xa77   : > { %2409 = vmatprep.subr.bf16.mxu0 %v3923_v57  ;;  %v3980_v57 = vld [vmem:[%s4907_s29 + $0x8] sm:$0xff]  }
 0xa7a   : > { %2410 = vmatpush1.bf16.msra.mxu0 %v3921_v59  ;;  %v3982_v59 = vld [vmem:[%s4907_s29 + $0x40] sm:$0xff]  }
 0xa7b   : > { %2411 = vmatprep.subr.bf16.mxu0 %v3929_v40  ;;  %v2182_v40 = vld [vmem:[%s4902_s27] sm:$0xf]  ;;  %s5432_s27 = sld [smem:[#allocation34_spill]] }
 0xa7e   : > { %2412 = vmatpush1.bf16.msra.mxu0 %v3927_v63  ;;  %v3985_v63 = vld [vmem:[%s4907_s29 + $0x80] sm:$0xff]  }
 0xa7f   : > { %2413 = vmatprep.subr.bf16.mxu0 %v3935_v1  ;;  %v2187_v1 = vrot.slane %v2182_v40, %v1321_v19 }
 0xa81   : > { %p3430_p13 = scmp.ne.s32.totalorder %s5432_s27, 1 }
 0xa82   : > { %2414 = vmatpush1.bf16.msra.mxu0 %v3933_v3  ;;  %v2191_v3 = vrot.slane %v2182_v40, %v1325_v18  ;;  %s5433_s6 = sld [smem:[#allocation62_spill]] (!%p3430_p13) }
 0xa83   : > { %2415 = vmatprep.subr.bf16.mxu0 %v3941_v5 }
 0xa86   : > { %2416 = vmatpush1.bf16.msra.mxu0 %v3939_v7 }
 0xa87   : > { %2417 = vmatprep.subr.bf16.mxu0 %v3947_v9 }
 0xa8a   : > { %2418 = vmatpush1.bf16.msra.mxu0 %v3945_v12 }
 0xa8b   : > { %2419 = vmatprep.subr.bf16.mxu0 %v3953_v14 }
 0xa8e   : > { %2420 = vmatpush1.bf16.msra.mxu0 %v3951_v16 }
 0xa8f   : > { %3524 = vmatprep.subr.bf16.mxu0 %v3955_v42 }
 0xb30   : > { %v2107_v37 = vpop.f32.mrf.mxu0 }
 0xb31   : > { %v2113_v10 = vadd.f32 %v2107_v37, %v4973_v39  ;;  %v3912_v39 = vld [vmem:[%s4896_s22 + $0xc0] ss:$16 sps:$4 sm:$0xff]   ;;  %s5431_s22 = scalar_lea.vmem [#allocation14], %s4836_s19 }
 0xb32   : > { %v3641_v41 = vpop.f32.mrf.mxu0  ;;  %2367 = vmatpush1.bf16.msra.mxu1 %v3912_v39  ;;  %v3961_v37 = vld [vmem:[%s4907_s29 + $0xb0] sm:$0xff]   ;;  %v3973_v39 = vld [vmem:[%s4907_s29 + $0x98] sm:$0xff]  }
 0xb33   : > { %v5130_v43 = vadd.f32 %v3358_v38, %v2113_v10  ;;  %2368 = vmatprep.subr.bf16.mxu1 %v3920_v56  ;;  %v3962_v38 = vld [vmem:[%s4907_s29 + $0x68] sm:$0xff]  }
 0xb34   : > { %v2110_v44 = vpop.f32.mrf.mxu0  ;;  %v3963_v10 = vld [vmem:[%s4907_s29 + $0xe8] sm:$0xff]  }
 0xb35   : > { %2124 = vadd.xlane.f32.xlu0 %v5130_v43  ;;  %v3964_v41 = vld [vmem:[%s4907_s29 + $0x28] sm:$0xff]  }
 0xb36   : > { %v3642_v45 = vpop.f32.mrf.mxu0  ;;  %2369 = vmatpush1.bf16.msra.mxu1 %v3918_v58  ;;  %v3965_v44 = vld [vmem:[%s4907_s29 + $0xa8] sm:$0xff]  }
 0xb37   : > { %2370 = vmatprep.subr.bf16.mxu1 %v3926_v62  ;;  %v3966_v45 = vld [vmem:[%s4907_s29 + $0x60] sm:$0xff]   ;;  %v3979_v56 = vld [vmem:[%s4907_s29 + $0xc8] sm:$0xff]  }
 0xb38   : > { %v3981_v58 = vld [vmem:[%s4907_s29 + $0x88] sm:$0xff]   ;;  %v3984_v62 = vld [vmem:[%s4907_s29] sm:$0xff]  }
 0xb3a   : > { %2371 = vmatpush1.bf16.msra.mxu1 %v3924_v60  ;;  %v3983_v60 = vld [vmem:[%s4907_s29 + $0xc0] sm:$0xff]  }
 0xb3b   : > { %2372 = vmatprep.subr.bf16.mxu1 %v3932_v0  ;;  %v2198_v0 = vsub.s32 3, %v5022_v17 }
 0xb3e   : > { %2373 = vmatpush1.bf16.msra.mxu1 %v3930_v2  ;;  %v2195_v2 = vrot.slane %v2182_v40, %v1329_v21 }
 0xb3f   : > { %2374 = vmatprep.subr.bf16.mxu1 %v3938_v4  ;;  %v2199_v4 = vrot.slane %v2182_v40, %v2198_v0 }
 0xb42   : > { %2375 = vmatpush1.bf16.msra.mxu1 %v3936_v6 }
 0xb43   : > { %2376 = vmatprep.subr.bf16.mxu1 %v3944_v8 }
 0xb46   : > { %2377 = vmatpush1.bf16.msra.mxu1 %v3942_v11 }
 0xb47   : > { %2378 = vmatprep.subr.bf16.mxu1 %v3950_v13 }
 0xb4a   : > { %2379 = vmatpush1.bf16.msra.mxu1 %v3948_v15 }
 0xb4b   : > { %3502 = vmatprep.subr.bf16.mxu1 %v3954_v31 }
 0xbbe   : > { %v2125_v52 = vpop.xlane.xlu0 %2124 }
 0xbbf   : > { %v2126_v53 = vmul.f32 0.0078125, %v2125_v52  ;;  %v3975_v52 = vld [vmem:[%s4907_s29 + $0xd0] sm:$0xff]  }
 0xbc1   : > { %v2127_v54 = vsub.f32 %v5130_v43, %v2126_v53  ;;  %v3976_v53 = vld [vmem:[%s4907_s29 + $0x10] sm:$0xff]  }
 0xbc3   : > { %v2128_v55 = vmul.f32 %v2127_v54, %v2127_v54 }
 0xbc5   : > { %2129 = vadd.xlane.f32.xlu1 %v2128_v55  ;;  %v3978_v55 = vld [vmem:[%s4907_s29 + $0x48] sm:$0xff]  }
 0xc4e   : > { %v2130_v20 = vpop.xlane.xlu1 %2129 }
 0xc4f   : > { %v2131_v22 = vmul.f32 0.0078125, %v2130_v20 }
 0xc51   : > { %v2132_v23 = vadd.f32 1e-05, %v2131_v22 }
 0xc53   : > { %4004 = vrsqrt.f32 %v2132_v23 }
 0xc60   : > { %v4005_v24 = vpop.eup %4004 }
 0xc61   : > { %v2134_v26 = vmul.f32 %v4005_v24, %v2127_v54  ;;  %v3977_v54 = vld [vmem:[%s4907_s29 + $0x90] sm:$0xff]  }
 0xc63   : > { %v2141_v28 = vmul.f32 %v3359_v25, %v2134_v26 }
 0xc65   : > { %v2148_v29 = vadd.f32 %v3360_v27, %v2141_v28 }
 0xc67   : > { %v2181_v30 = vpack.c.bf16 %v2148_v29, %v2148_v29 }
 0xc69   : > { %2397 = vmatmul.mubr.bf16.vlgmr.msra.gmra.mxu1 %v2181_v30  ;;  %2438 = vmatmul.mubr.bf16.vlgmr.msra.gmra.mxu0 %v2181_v30 }
 0xc6a   : > { %3503 = vmatpush3.bf16.msra.mxu1 %v3956_v32  ;;  %3525 = vmatpush3.bf16.msra.mxu0 %v3957_v33 }
 0xc6b   : > { %3504 = vmatprep.subr.bf16.mxu1 %v3958_v34  ;;  %3526 = vmatprep.subr.bf16.mxu0 %v3959_v35 }
 0xc6e   : > { %3505 = vmatpush3.bf16.msra.mxu1 %v3960_v36  ;;  %3527 = vmatpush3.bf16.msra.mxu0 %v3961_v37 }
 0xc6f   : > { %3506 = vmatprep.subr.bf16.mxu1 %v3962_v38  ;;  %3528 = vmatprep.subr.bf16.mxu0 %v3963_v10 }
 0xc72   : > { %3507 = vmatpush3.bf16.msra.mxu1 %v3964_v41  ;;  %3529 = vmatpush3.bf16.msra.mxu0 %v3965_v44 }
 0xc73   : > { %3508 = vmatprep.subr.bf16.mxu1 %v3966_v45  ;;  %3530 = vmatprep.subr.bf16.mxu0 %v3967_v46 }
 0xc76   : > { %3509 = vmatpush3.bf16.msra.mxu1 %v3968_v47  ;;  %3531 = vmatpush3.bf16.msra.mxu0 %v3969_v61 }
 0xc77   : > { %3510 = vmatprep.subr.bf16.mxu1 %v3970_v48  ;;  %3532 = vmatprep.subr.bf16.mxu0 %v3971_v49 }
 0xc7a   : > { %3511 = vmatpush3.bf16.msra.mxu1 %v3972_v50  ;;  %3533 = vmatpush3.bf16.msra.mxu0 %v3973_v39 }
 0xc7b   : > { %3512 = vmatprep.subr.bf16.mxu1 %v3974_v51  ;;  %3534 = vmatprep.subr.bf16.mxu0 %v3975_v52 }
 0xc7e   : > { %3513 = vmatpush3.bf16.msra.mxu1 %v3976_v53  ;;  %3535 = vmatpush3.bf16.msra.mxu0 %v3977_v54 }
 0xc7f   : > { %3514 = vmatprep.subr.bf16.mxu1 %v3978_v55  ;;  %3536 = vmatprep.subr.bf16.mxu0 %v3979_v56  ;;  %v3429_v56 = vld [vmem:[%s5431_s22] ss:$0 sm:$0xff] }
 0xc82   : > { %3515 = vmatpush3.bf16.msra.mxu1 %v3980_v57  ;;  %3537 = vmatpush3.bf16.msra.mxu0 %v3981_v58 }
 0xc83   : > { %3516 = vmatprep.subr.bf16.mxu1 %v3982_v59  ;;  %3538 = vmatprep.subr.bf16.mxu0 %v3983_v60 }
 0xc86   : > { %3517 = vmatpush3.bf16.msra.mxu1 %v3984_v62  ;;  %3539 = vmatpush3.bf16.msra.mxu0 %v3985_v63 }
 0xd29   : > { %v2398_v5 = vpop.f32.mrf.mxu1  ;;  %v2439_v6 = vpop.f32.mrf.mxu0 }
 0xd2a   : > { %v2399_v7 = vadd.f32 %v2398_v5, %v2187_v1  ;;  %v2440_v8 = vadd.f32 %v2439_v6, %v2195_v2 }
 0xd2b   : > { %v2400_v9 = vpop.f32.mrf.mxu1  ;;  %v2441_v11 = vpop.f32.mrf.mxu0 }
 0xd2c   : > { %v3393_v12 = vmul.f32 -1.702, %v2399_v7  ;;  %v3395_v13 = vmul.f32 -1.702, %v2440_v8  ;;  %v2401_v14 = vadd.f32 %v2400_v9, %v2191_v3  ;;  %v2442_v15 = vadd.f32 %v2441_v11, %v2199_v4 }
 0xd2d   : > { %v2402_v16 = vpop.f32.mrf.mxu1  ;;  %v2443_v20 = vpop.f32.mrf.mxu0 }
 0xd2e   : > { %v2454_v19 = vmul.f32 1.442695, %v3393_v12  ;;  %v2458_v22 = vmul.f32 1.442695, %v3395_v13  ;;  %v3394_v23 = vmul.f32 -1.702, %v2401_v14 }
 0xd2f   : > { %v3396_v21 = vmul.f32 -1.702, %v2442_v15  ;;  %v2403_v24 = vpop.f32.mrf.mxu1  ;;  %v2444_v17 = vpop.f32.mrf.mxu0 }
 0xd30   : > { %4006 = vpow2.f32 %v2454_v19  ;;  %v2456_v18 = vmul.f32 1.442695, %v3394_v23 }
 0xd31   : > { %4008 = vpow2.f32 %v2458_v22  ;;  %v2460_v25 = vmul.f32 1.442695, %v3396_v21 }
 0xd32   : > { %4010 = vpow2.f32 %v2456_v18 }
 0xd33   : > { %4012 = vpow2.f32 %v2460_v25 }
 0xd3d   : > { %v4007_v26 = vpop.eup %4006 }
 0xd3e   : > { %v4009_v27 = vpop.eup %4008  ;;  %v2462_v28 = vadd.f32 1.0, %v4007_v26 }
 0xd3f   : > { %v4011_v29 = vpop.eup %4010  ;;  %v2464_v30 = vadd.f32 1.0, %v4009_v27 }
 0xd40   : > { %v4013_v31 = vpop.eup %4012  ;;  %4014 = vrcp.f32 %v2462_v28  ;;  %v2463_v42 = vadd.f32 1.0, %v4011_v29 }
 0xd41   : > { %4016 = vrcp.f32 %v2464_v30  ;;  %v2465_v32 = vadd.f32 1.0, %v4013_v31 }
 0xd42   : > { %4018 = vrcp.f32 %v2463_v42 }
 0xd43   : > { %4020 = vrcp.f32 %v2465_v32 }
 0xd4d   : > { %v4015_v33 = vpop.eup %4014 }
 0xd4e   : > { %v4017_v34 = vpop.eup %4016  ;;  %v2474_v36 = vmul.f32 %v4015_v33, %v2399_v7 }
 0xd4f   : > { %v4019_v35 = vpop.eup %4018  ;;  %v2476_v38 = vmul.f32 %v4017_v34, %v2440_v8 }
 0xd50   : > { %v4021_v37 = vpop.eup %4020  ;;  %v2475_v10 = vmul.f32 %v4019_v35, %v2401_v14  ;;  %v2542_v45 = vpack.c.bf16 %v2474_v36, %v2474_v36 }
 0xd51   : > { %v2477_v41 = vmul.f32 %v4021_v37, %v2442_v15  ;;  %v2544_v47 = vpack.c.bf16 %v2476_v38, %v2476_v38 }
 0xd52   : > { %v2543_v44 = vpack.c.bf16 %v2475_v10, %v2475_v10 }
 0xd53   : > { %v2545_v46 = vpack.c.bf16 %v2477_v41, %v2477_v41 }
 0xd54   : > { %2770 = vmatprep.mubr.bf16.mxu1 %v2543_v44 }
 0xd55   : > { %2810 = vmatprep.mubr.bf16.mxu0 %v2545_v46  ;;  %2771 = vmatmul.mubr.bf16.vlgmr.msra.gmra.mxu1 %v2542_v45 }
 0xd56   : > { %2811 = vmatmul.mubr.bf16.vlgmr.msra.gmra.mxu0 %v2544_v47 }
 0xe15   : > { %v3518_v61 = vpop.f32.mrf.mxu1 }
 0xe16   : > { %v3540_v48 = vpop.f32.mrf.mxu0 }
 0xe17   : > { %v3519_v49 = vpop.f32.mrf.mxu1 }
 0xe18   : > { %v3520_v50 = vadd.f32 %v3519_v49, %v3518_v61  ;;  %v3541_v39 = vpop.f32.mrf.mxu0 }
 0xe19   : > { %v3542_v51 = vadd.f32 %v3541_v39, %v3540_v48  ;;  %v3521_v52 = vpop.f32.mrf.mxu1 }
 0xe1a   : > { %v3543_v53 = vpop.f32.mrf.mxu0 }
 0xe1b   : > { %v2813_v54 = vadd.f32 %v3542_v51, %v3520_v50  ;;  %v3522_v55 = vpop.f32.mrf.mxu1 }
 0xe1c   : > { %v3544_v57 = vpop.f32.mrf.mxu0 }
 0xe1d   : > { %v2818_v58 = vadd.f32 %v2813_v54, %v5130_v43  ;;  %2831 = sbr.rel (%p3430_p13) target bundleno = 4128 (0x1020), region = 152 }
 0xe1f   : > { %v2826_v59 = vadd.f32 %v3429_v56, %v2818_v58 }
 0xe21   : > { %2827 = vst [vmem:[%s4970_s14] sm:$0xff] %v2826_v59 }
 0xe22   : > { %vm2834_vm7 = vcmask 1040384   ;;  %v4022_v62 = vld [vmem:[%s5433_s6 + $0x38] sm:$0xff]   ;;  %v4465_v63 = vmov 0.0   ;;  %v4023_v40 = vld [vmem:[%s5433_s6 + $0x30] sm:$0xff]   ;;  %v4024_v4 = vld [vmem:[%s5433_s6 + $0x28] sm:$0xff]   ;;  %vm4466_vm8 = vmmov 0  }
 0xe23   : > { %v2835_v60 = vsel %vm2834_vm7, %v2826_v59, 0.0  ;;  %3643 = vmatprep.subr.bf16.mxu0 %v4465_v63  ;;  %v4025_v5 = vld [vmem:[%s5433_s6 + $0x20] sm:$0xff]   ;;  %3659 = vmatprep.mubr.msk.bf16.mxu0 %vm4466_vm8, %v4465_v63  ;;  %v4026_v6 = vld [vmem:[%s5433_s6 + $0x18] sm:$0xff]   ;;  %v4027_v7 = vld [vmem:[%s5433_s6 + $0x10] sm:$0xff]   ;;  %vm2956_vm9 = vcmask 516096  }
 0xe24   : > { %2836 = vadd.xlane.f32.xlu0 %v2835_v60  ;;  %3644 = vmatpush3.bf16.msra.mxu0 %v4022_v62  ;;  %v4028_v8 = vld [vmem:[%s5433_s6 + $0x8] sm:$0xff]   ;;  %v4029_v9 = vld [vmem:[%s5433_s6] sm:$0xff]   ;;  %v2867_v21 = vld [vmem:[#allocation18] sm:$0x1] }
 0xe25   : > { %3645 = vmatprep.subr.bf16.mxu0 %v4465_v63  ;;  %v2832_v15 = vld [vmem:[#allocation15] sm:$0x1]  ;;  %v2833_v20 = vld [vmem:[#allocation17] sm:$0x1] }
 0xe28   : > { %3646 = vmatpush3.bf16.msra.mxu0 %v4023_v40 }
 0xe29   : > { %3647 = vmatprep.subr.bf16.mxu0 %v4465_v63 }
 0xe2c   : > { %3648 = vmatpush3.bf16.msra.mxu0 %v4024_v4 }
 0xe2d   : > { %3649 = vmatprep.subr.bf16.mxu0 %v4465_v63 }
 0xe30   : > { %3650 = vmatpush3.bf16.msra.mxu0 %v4025_v5 }
 0xe31   : > { %3651 = vmatprep.subr.bf16.mxu0 %v4465_v63 }
 0xe34   : > { %3652 = vmatpush3.bf16.msra.mxu0 %v4026_v6 }
 0xe35   : > { %3653 = vmatprep.subr.bf16.mxu0 %v4465_v63 }
 0xe38   : > { %3654 = vmatpush3.bf16.msra.mxu0 %v4027_v7 }
 0xe39   : > { %3655 = vmatprep.subr.bf16.mxu0 %v4465_v63 }
 0xe3c   : > { %3656 = vmatpush3.bf16.msra.mxu0 %v4028_v8 }
 0xe3d   : > { %3657 = vmatprep.subr.bf16.mxu0 %v4465_v63 }
 0xe40   : > { %3658 = vmatpush3.bf16.msra.mxu0 %v4029_v9 }
 0xead   : > { %v2837_v43 = vpop.xlane.xlu0 %2836 }
 0xeae   : > { %v2838_v0 = vmul.f32 0.0078125, %v2837_v43 }
 0xeb0   : > { %v2839_v1 = vsub.f32 %v2826_v59, %v2838_v0 }
 0xeb2   : > { %v2840_v2 = vmul.f32 %v2839_v1, %v2839_v1 }
 0xeb4   : > { %v2841_v3 = vsel %vm2834_vm7, %v2840_v2, 0.0 }
 0xeb5   : > { %2842 = vadd.xlane.f32.xlu0 %v2841_v3 }
 0xf3e   : > { %v2843_v11 = vpop.xlane.xlu0 %2842 }
 0xf3f   : > { %v2844_v12 = vmul.f32 0.0078125, %v2843_v11 }
 0xf41   : > { %v2845_v13 = vadd.f32 1e-05, %v2844_v12 }
 0xf43   : > { %4030 = vrsqrt.f32 %v2845_v13 }
 0xf50   : > { %v4031_v14 = vpop.eup %4030 }
 0xf51   : > { %v2847_v16 = vmul.f32 %v4031_v14, %v2839_v1 }
 0xf53   : > { %v2848_v19 = vmul.f32 %v2847_v16, %v2832_v15 }
 0xf55   : > { %v2849_v22 = vadd.f32 %v2848_v19, %v2833_v20 }
 0xf57   : > { %v2866_v23 = vpack.c.bf16 %v2849_v22, %v2849_v22 }
 0xf59   : > { %3660 = vmatmul.mubr.bf16.vlgmr.msra.gmra.mxu0 %v2866_v23 }
0x1019   : > { %v2950_v24 = vpop.f32.mrf.mxu0 }
0x101a   : > { %v2951_v17 = vadd.f32 %v2950_v24, %v2867_v21 }
0x101b   : > { %v3661_v18 = vpop.f32.mrf.mxu0 }
0x101c   : > { %2957 = vst.msk [vmem:[%s4911_s3] sm:$0x1] %vm2956_vm9, %v2951_v17 }
0x101d   : > { %v2953_v25 = vpop.f32.mrf.mxu0 }
0x101f   : > { %v3662_v26 = vpop.f32.mrf.mxu0 }
0x1020 PF: > { %s5434_s5 = sld [smem:[#allocation33_spill]]  ;;  %s2971_s27 = sshll.u32 %s4911_s3, 4  ;;  %s2972_s27 = int_to_ptr.vmem [resolvable:$true] %s2971_s27 }
0x1021   : > { %s5435_s7 = sld [smem:[#allocation29_spill]]  ;;  %s4304_s19 = scalar_lea.vmem %s2972_s27, 16 }
0x1022   : > { %s5436_s15 = sld [smem:[#allocation38_spill]]  ;;  %p4305_p12 = scmp.ne.s32.totalorder %s2972_s27, %s4304_s19 }
0x1023   : > { %s5437_s13 = sld [smem:[#allocation63_spill]]  ;;  %s4467_s12 = smov [#allocation20]  }
0x1024   : > { %s4308_s0 = sshll.u32 %s4467_s12, 4  ;;  %s4309_s0 = int_to_ptr.vmem [resolvable:$false] %s4308_s0 }
0x1025   : > { %s4310_s25 = scalar_lea.vmem %s4309_s0, 32  ;;  %p4311_p8 = scmp.lt.s32.totalorder %s2972_s27, %s4309_s0 }
0x1026   : > { %s3439_s10 = sshll.u32 %s5434_s5, 4  ;;  %p4312_p11 = scmp.lt.s32.totalorder %s4310_s25, %s4304_s19 }
0x1027   : > { %s5438_s29 = sand.u32 1, %s5435_s7  }
0x1028   : > { %s2959_s26 = scalar_lea.sflag [#allocation5], %s5438_s29  ;;  %p5439_p5 = scmp.ne.s32.totalorder %s5436_s15, 0 }
0x1029   : > { %s2969_s22 = scalar_lea.hbm %s5437_s13, %s3439_s10  ;;  %p4313_p10 = por %p4312_p11, %p4311_p8 }
0x102a   : > { %p4306_p9 = pnand %p4305_p12, %p5439_p5 }
0x102c   : > { %p4307_p6 = pneg %p4306_p9 }
0x102e   : > { %p4314_p2 = pnand %p4313_p10, %p4307_p6 }
0x1030   : > { %4317 = shalt.err (!%p4314_p2)
}
0x1031   : > { %s4318_s28 = scalar_lea.hbm %s2969_s22, 16  ;;  %s4322_s11 = scalar_lea.hbm %s5437_s13, 64 }
0x1032   : > { %p4319_p0 = scmp.ne.s32.totalorder %s2969_s22, %s4318_s28  ;;  %p4323_p3 = scmp.lt.s32.totalorder %s2969_s22, %s5437_s13 }
0x1033   : > { %p4324_p7 = scmp.lt.s32.totalorder %s4322_s11, %s4318_s28 }
0x1034   : > { %p4320_p1 = pnand %p4319_p0, %p5439_p5 }
0x1035   : > { %p4325_p13 = por %p4324_p7, %p4323_p3 }
0x1036   : > { %p4321_p4 = pneg %p4320_p1 }
0x1038   : > { %p4326_p12 = pnand %p4325_p13, %p4321_p4 }
0x103a   : > { %4329 = shalt.err (!%p4326_p12)
}
0x103b   : > { %3695 = dma.vmem_to_hbm [thread:$0]  (%p5439_p5), %s2972_s27, 16, %s2969_s22, %s2959_s26  }
0x103c PF: > { %s5440_s2 = sld [smem:[#allocation36_spill]] }
0x103d   : > { %s5441_s14 = sld [smem:[#allocation28_spill]] }
0x103e   : > { %s5442_s24 = sld [smem:[#allocation39_spill]] }
0x1042   : > { %p3742_p9 = scmp.ge.s32.totalorder %s5440_s2, 2 }
0x1043   : > { %s2983_s4 = sand.u32 1, %s5441_s14  }
0x1044   : > { %p5443_p6 = scmp.ne.s32.totalorder %s5442_s24, 0  ;;  %s2984_s8 = scalar_lea.sflag [#allocation5], %s2983_s4 }
0x1046   : > { %p3730_p8 = pnand %p3742_p9, %p5443_p6 }
0x1048   : > { %p3731_p11 = pneg %p3730_p8 }
0x104a   : > { %4399 = dma.done.wait (%p3731_p11), %s2984_s8, 16  }
0x104b   : > { %4401 = vsyncadd (%p3731_p11), %s2984_s8, 4294967280  ;;  %s46_s5 = sadd.s32 1, %s5440_s2   ;;  %s5444_s2 = sld [smem:[#allocation29_spill]] }
0x104c   : > { %p43_p10 = scmp.ge.s32.totalorder %s46_s5, 10   ;;  %s5445_s25 = sld [smem:[#allocation30_spill]] }
0x104d   : > { %s5446_s26 = sld [smem:[#allocation42_spill]]  ;;  %s5453_s0 = smov %s4440_s30 }
0x104e   : > { %s5447_s27 = sld [smem:[#allocation31_spill]] }
0x104f   : > { %s5448_s3 = sld [smem:[#allocation32_spill]] }
0x1050   : > { %s5449_s28 = sld [smem:[#allocation43_spill]] }
0x1051   : > { %s5450_s29 = sld [smem:[#allocation35_spill]] }
0x1052   : > { %s5451_s4 = sld [smem:[#allocation40_spill]] }
0x1053   : > { %s5452_s7 = sld [smem:[#allocation41_spill]] }
0x1055   :  { %45 = sbr.rel (!%p43_p10) target bundleno = 37 (0x25), region = 256 }
0x1059   : > { %s5454_s30 = smov %s5452_s7 }
0x105a   :  { %2988 = vsyncpa [#allocation4], 1 }
0x105b   :  { %2990 = vsyncpa [#allocation4 + $0x1], 1 }
0x105c   :  { %2991 = vsyncpa [#allocation7], 1 }
0x105d   :  { %2993 = vsyncpa [#allocation7 + $0x1], 1 }
0x105e   :  { %2994 = vsyncpa [#allocation10], 1 }
0x105f   :  { %2996 = vsyncpa [#allocation10 + $0x1], 1 }
0x1060   :  { %2997 = vsyncpa [#allocation13], 1 }
0x1061   :  { %2999 = vsyncpa [#allocation13 + $0x1], 1 }
0x1062   :  { %3000 = vsyncpa [#allocation16], 1 }
0x1063   :  { %3001 = vsyncpa [#allocation19], 1 }
0x1064   :  { %3002 = vsyncpa [#allocation5], 1 }
0x1065   :  { %3004 = vsyncpa [#allocation5 + $0x1], 1 }

</bundles_post_ra>
